<compile_context>
chip_gen: v5e
topology: v5e:2x2
jax: 0.10.0
libtpu: 0.0.40
codegen_flags: <defaults>
</compile_context>

<pallas_src>
import functools

import jax
import jax.numpy as jnp
from jax.experimental import pallas as pl
from jax.experimental.pallas import tpu as pltpu


def _lstm_kernel(x_ref, wih0_ref, whh0_ref, b0_ref,
                 w1_ref, b1_ref, fcw_ref, fcb_ref,
                 out_ref,
                 xp_ref,
                 *, hidden_size, seq_len):
    H = hidden_size

    # Layer-0 input projection for all timesteps in one MXU op (bias folded in).
    xp_ref[...] = (
        jnp.dot(x_ref[...], wih0_ref[...], preferred_element_type=jnp.float32)
        + b0_ref[...])                                   # (seq, 4H)

    # Hoist weight loads out of the time loop.
    whh0 = whh0_ref[...]                                 # (H, 4H)
    w1 = w1_ref[...]                                     # (2H, 4H) = [Wih1; Whh1]
    b1 = b1_ref[...]                                     # (1, 4H)

    def cell_update(gates, c):
        # Full-vreg activations on the whole (1, 4H) gate vector, then static
        # lane slices for the recombination (PyTorch gate order i, f, g, o).
        s = jax.nn.sigmoid(gates)
        th = jnp.tanh(gates)
        i = s[:, 0 * H:1 * H]
        f = s[:, 1 * H:2 * H]
        g = th[:, 2 * H:3 * H]
        o = s[:, 3 * H:4 * H]
        c_new = f * c + i * g
        h_new = o * jnp.tanh(c_new)
        return h_new, c_new

    def step(t, carry):
        h0, c0, h1, c1 = carry
        # Layer 0: only the recurrent matmul is serial.
        g0 = xp_ref[pl.ds(t, 1), :] + jnp.dot(
            h0, whh0, preferred_element_type=jnp.float32)
        h0, c0 = cell_update(g0, c0)
        # Layer 1: fused input+recurrent matmul.
        xh = jnp.concatenate([h0, h1], axis=-1)          # (1, 2H)
        g1 = jnp.dot(xh, w1, preferred_element_type=jnp.float32) + b1
        h1, c1 = cell_update(g1, c1)
        return (h0, c0, h1, c1)

    z = jnp.zeros((1, H), jnp.float32)
    _, _, h1, _ = jax.lax.fori_loop(0, seq_len, step, (z, z, z, z),
                                    unroll=True)

    # fc on the last timestep's top-layer hidden state; the module returns
    # out[-1][0] (selected in the wrapper).
    out_ref[...] = (jnp.dot(h1, fcw_ref[...],
                            preferred_element_type=jnp.float32)
                    + fcb_ref[...])


def lstm_2_layer_forward(x, params, hidden_size):
    """x: (seq, input_size) float32. Returns scalar = fc(lstm(x))[-1][0]."""
    seq, input_size = x.shape
    H = hidden_size
    out_size = params["fc_w"].shape[1]

    # Stack layer-1 input & recurrent weights once so the kernel does a single
    # [h0_t, h1_{t-1}] @ W matmul per step.
    w1cat = jnp.concatenate([params["wih1"], params["whh1"]], axis=0)  # (2H, 4H)

    kernel = functools.partial(_lstm_kernel, hidden_size=H, seq_len=seq)
    vmem = pl.BlockSpec(memory_space=pltpu.MemorySpace.VMEM)

    out = pl.pallas_call(
        kernel,
        out_shape=jax.ShapeDtypeStruct((1, out_size), jnp.float32),
        in_specs=[vmem] * 8,
        out_specs=vmem,
        scratch_shapes=[pltpu.VMEM((seq, 4 * H), jnp.float32)],  # x @ Wih0 + b0
    )(x,
      params["wih0"], params["whh0"], params["b0"],
      w1cat, params["b1"],
      params["fc_w"], params["fc_b"])

    return out[0, 0]


def _reference_forward(x, params, hidden_size):
    """Pure-JAX reference of the same semantics (for verification)."""
    H = hidden_size

    def cell(x_in, h, c, wih, whh, b):
        gates = x_in @ wih + h @ whh + b
        i = jax.nn.sigmoid(gates[:, 0 * H:1 * H])
        f = jax.nn.sigmoid(gates[:, 1 * H:2 * H])
        g = jnp.tanh(gates[:, 2 * H:3 * H])
        o = jax.nn.sigmoid(gates[:, 3 * H:4 * H])
        c_new = f * c + i * g
        return o * jnp.tanh(c_new), c_new

    def step(carry, x_t):
        h0, c0, h1, c1 = carry
        h0, c0 = cell(x_t[None, :], h0, c0,
                      params["wih0"], params["whh0"], params["b0"])
        h1, c1 = cell(h0, h1, c1,
                      params["wih1"], params["whh1"], params["b1"])
        return (h0, c0, h1, c1), h1

    z = jnp.zeros((1, H), jnp.float32)
    _, hs = jax.lax.scan(step, (z, z, z, z), x)
    out = hs[:, 0, :] @ params["fc_w"] + params["fc_b"]
    return out[-1, 0]


def init_params(key, input_size, hidden_size, output_size):
    """Deterministic init mimicking PyTorch's U(-1/sqrt(H), 1/sqrt(H))."""
    H = hidden_size
    k = 1.0 / jnp.sqrt(jnp.float32(H))
    keys = jax.random.split(key, 11)
    u = lambda kk, shape: jax.random.uniform(
        kk, shape, jnp.float32, minval=-k, maxval=k)
    params = {
        # stored as (in_dim, 4H) == PyTorch weight_ih_l*.T / weight_hh_l*.T
        "wih0": u(keys[0], (input_size, 4 * H)),
        "whh0": u(keys[1], (H, 4 * H)),
        "b0": (u(keys[2], (1, 4 * H)) + u(keys[3], (1, 4 * H))),  # b_ih + b_hh
        "wih1": u(keys[4], (H, 4 * H)),
        "whh1": u(keys[5], (H, 4 * H)),
        "b1": (u(keys[6], (1, 4 * H)) + u(keys[7], (1, 4 * H))),
        "fc_w": u(keys[8], (H, output_size)),   # nn.Linear weight.T
        "fc_b": u(keys[9], (1, output_size)),
    }
    return params


if __name__ == "__main__":
    input_size = 16
    hidden_size = 32
    num_layers = 2
    output_size = 4
    seq_len = 8

    key = jax.random.PRNGKey(0)
    kx, kp = jax.random.split(key)
    x = jax.random.normal(kx, (seq_len, input_size), jnp.float32)
    params = init_params(kp, input_size, hidden_size, output_size)

    result = lstm_2_layer_forward(x, params, hidden_size)
    result = jax.block_until_ready(result)

    ref = _reference_forward(x, params, hidden_size)
    assert jnp.allclose(result, ref, atol=1e-4, rtol=1e-4), (result, ref)

    print("KERNEL_OK")
</pallas_src>

<mosaic_0001>
module attributes {stable_mosaic.version = 11 : i64} {
  func.func @_lstm_kernel(%arg0: memref<8x16xf32, #tpu.memory_space<vmem>>, %arg1: memref<16x128xf32, #tpu.memory_space<vmem>>, %arg2: memref<32x128xf32, #tpu.memory_space<vmem>>, %arg3: memref<1x128xf32, #tpu.memory_space<vmem>>, %arg4: memref<64x128xf32, #tpu.memory_space<vmem>>, %arg5: memref<1x128xf32, #tpu.memory_space<vmem>>, %arg6: memref<32x4xf32, #tpu.memory_space<vmem>>, %arg7: memref<1x4xf32, #tpu.memory_space<vmem>>, %arg8: memref<1x4xf32, #tpu.memory_space<vmem>>, %arg9: memref<8x128xf32, #tpu.memory_space<vmem>>) attributes {dimension_semantics = [], scalar_prefetch = 0 : i64, scratch_operands = 1 : i64, tpu.core_type = #tpu.core_type<tc>} {
    %c0 = arith.constant 0 : index
    %c0_0 = arith.constant 0 : index
    %0 = vector.load %arg0[%c0, %c0_0] : memref<8x16xf32, #tpu.memory_space<vmem>>, vector<8x16xf32>
    %c0_1 = arith.constant 0 : index
    %c0_2 = arith.constant 0 : index
    %1 = vector.load %arg1[%c0_1, %c0_2] : memref<16x128xf32, #tpu.memory_space<vmem>>, vector<16x128xf32>
    %cst = arith.constant dense<0.000000e+00> : vector<8x128xf32>
    %2 = tpu.matmul %0, %1, %cst {dimension_numbers = #tpu.dot_dimension_numbers<[1], [0], [0], [1], [0, 0, 1, 1], [], []>} : vector<8x16xf32>, vector<16x128xf32>, vector<8x128xf32> -> vector<8x128xf32>
    %c0_3 = arith.constant 0 : index
    %c0_4 = arith.constant 0 : index
    %3 = vector.load %arg3[%c0_3, %c0_4] : memref<1x128xf32, #tpu.memory_space<vmem>>, vector<1x128xf32>
    %4 = vector.broadcast %3 : vector<1x128xf32> to vector<8x128xf32>
    %5 = arith.addf %2, %4 : vector<8x128xf32>
    %c0_5 = arith.constant 0 : index
    %c0_6 = arith.constant 0 : index
    %6 = vector.load %arg9[%c0_5, %c0_6] : memref<8x128xf32, #tpu.memory_space<vmem>>, vector<8x128xf32>
    tpu.vector_store %arg9[%c0_5, %c0_6], %5 {strides = array<i32>} : memref<8x128xf32, #tpu.memory_space<vmem>>, vector<8x128xf32>,
    %c0_7 = arith.constant 0 : index
    %c0_8 = arith.constant 0 : index
    %7 = vector.load %arg2[%c0_7, %c0_8] : memref<32x128xf32, #tpu.memory_space<vmem>>, vector<32x128xf32>
    %c0_9 = arith.constant 0 : index
    %c0_10 = arith.constant 0 : index
    %8 = vector.load %arg4[%c0_9, %c0_10] : memref<64x128xf32, #tpu.memory_space<vmem>>, vector<64x128xf32>
    %c0_11 = arith.constant 0 : index
    %c0_12 = arith.constant 0 : index
    %9 = vector.load %arg5[%c0_11, %c0_12] : memref<1x128xf32, #tpu.memory_space<vmem>>, vector<1x128xf32>
    %cst_13 = arith.constant 0.000000e+00 : f32
    %10 = vector.broadcast %cst_13 : f32 to vector<1x32xf32>
    %c0_i32 = arith.constant 0 : i32
    %11 = arith.index_cast %c0_i32 : i32 to index
    %c0_14 = arith.constant 0 : index
    %12 = vector.load %arg9[%11, %c0_14] : memref<8x128xf32, #tpu.memory_space<vmem>>, vector<1x128xf32>
    %cst_15 = arith.constant dense<0.000000e+00> : vector<1x128xf32>
    %13 = tpu.matmul %10, %7, %cst_15 {dimension_numbers = #tpu.dot_dimension_numbers<[1], [0], [0], [1], [0, 0, 1, 1], [], []>} : vector<1x32xf32>, vector<32x128xf32>, vector<1x128xf32> -> vector<1x128xf32>
    %14 = arith.addf %12, %13 : vector<1x128xf32>
    %15 = arith.negf %14 : vector<1x128xf32>
    %16 = math.exp %15 : vector<1x128xf32>
    %cst_16 = arith.constant 1.000000e+00 : f32
    %17 = vector.broadcast %cst_16 : f32 to vector<1x128xf32>
    %18 = arith.addf %17, %16 : vector<1x128xf32>
    %19 = arith.divf %17, %18 : vector<1x128xf32>
    %20 = math.tanh %14 : vector<1x128xf32>
    %21 = vector.extract_strided_slice %19 {offsets = [0, 0], sizes = [1, 32], strides = [1, 1]} : vector<1x128xf32> to vector<1x32xf32>
    %22 = vector.extract_strided_slice %19 {offsets = [0, 32], sizes = [1, 32], strides = [1, 1]} : vector<1x128xf32> to vector<1x32xf32>
    %23 = vector.extract_strided_slice %20 {offsets = [0, 64], sizes = [1, 32], strides = [1, 1]} : vector<1x128xf32> to vector<1x32xf32>
    %24 = vector.extract_strided_slice %19 {offsets = [0, 96], sizes = [1, 32], strides = [1, 1]} : vector<1x128xf32> to vector<1x32xf32>
    %25 = arith.mulf %22, %10 : vector<1x32xf32>
    %26 = arith.mulf %21, %23 : vector<1x32xf32>
    %27 = arith.addf %25, %26 : vector<1x32xf32>
    %28 = math.tanh %27 : vector<1x32xf32>
    %29 = arith.mulf %24, %28 : vector<1x32xf32>
    %30 = tpu.concatenate %29, %10 in 1 : vector<1x32xf32>, vector<1x32xf32> -> vector<1x64xf32>
    %cst_17 = arith.constant dense<0.000000e+00> : vector<1x128xf32>
    %31 = tpu.matmul %30, %8, %cst_17 {dimension_numbers = #tpu.dot_dimension_numbers<[1], [0], [0], [1], [0, 0, 1, 1], [], []>} : vector<1x64xf32>, vector<64x128xf32>, vector<1x128xf32> -> vector<1x128xf32>
    %32 = arith.addf %31, %9 : vector<1x128xf32>
    %33 = arith.negf %32 : vector<1x128xf32>
    %34 = math.exp %33 : vector<1x128xf32>
    %cst_18 = arith.constant 1.000000e+00 : f32
    %35 = vector.broadcast %cst_18 : f32 to vector<1x128xf32>
    %36 = arith.addf %35, %34 : vector<1x128xf32>
    %37 = arith.divf %35, %36 : vector<1x128xf32>
    %38 = math.tanh %32 : vector<1x128xf32>
    %39 = vector.extract_strided_slice %37 {offsets = [0, 0], sizes = [1, 32], strides = [1, 1]} : vector<1x128xf32> to vector<1x32xf32>
    %40 = vector.extract_strided_slice %37 {offsets = [0, 32], sizes = [1, 32], strides = [1, 1]} : vector<1x128xf32> to vector<1x32xf32>
    %41 = vector.extract_strided_slice %38 {offsets = [0, 64], sizes = [1, 32], strides = [1, 1]} : vector<1x128xf32> to vector<1x32xf32>
    %42 = vector.extract_strided_slice %37 {offsets = [0, 96], sizes = [1, 32], strides = [1, 1]} : vector<1x128xf32> to vector<1x32xf32>
    %43 = arith.mulf %40, %10 : vector<1x32xf32>
    %44 = arith.mulf %39, %41 : vector<1x32xf32>
    %45 = arith.addf %43, %44 : vector<1x32xf32>
    %46 = math.tanh %45 : vector<1x32xf32>
    %47 = arith.mulf %42, %46 : vector<1x32xf32>
    %c1_i32 = arith.constant 1 : i32
    %48 = arith.index_cast %c1_i32 : i32 to index
    %c0_19 = arith.constant 0 : index
    %49 = vector.load %arg9[%48, %c0_19] : memref<8x128xf32, #tpu.memory_space<vmem>>, vector<1x128xf32>
    %cst_20 = arith.constant dense<0.000000e+00> : vector<1x128xf32>
    %50 = tpu.matmul %29, %7, %cst_20 {dimension_numbers = #tpu.dot_dimension_numbers<[1], [0], [0], [1], [0, 0, 1, 1], [], []>} : vector<1x32xf32>, vector<32x128xf32>, vector<1x128xf32> -> vector<1x128xf32>
    %51 = arith.addf %49, %50 : vector<1x128xf32>
    %52 = arith.negf %51 : vector<1x128xf32>
    %53 = math.exp %52 : vector<1x128xf32>
    %cst_21 = arith.constant 1.000000e+00 : f32
    %54 = vector.broadcast %cst_21 : f32 to vector<1x128xf32>
    %55 = arith.addf %54, %53 : vector<1x128xf32>
    %56 = arith.divf %54, %55 : vector<1x128xf32>
    %57 = math.tanh %51 : vector<1x128xf32>
    %58 = vector.extract_strided_slice %56 {offsets = [0, 0], sizes = [1, 32], strides = [1, 1]} : vector<1x128xf32> to vector<1x32xf32>
    %59 = vector.extract_strided_slice %56 {offsets = [0, 32], sizes = [1, 32], strides = [1, 1]} : vector<1x128xf32> to vector<1x32xf32>
    %60 = vector.extract_strided_slice %57 {offsets = [0, 64], sizes = [1, 32], strides = [1, 1]} : vector<1x128xf32> to vector<1x32xf32>
    %61 = vector.extract_strided_slice %56 {offsets = [0, 96], sizes = [1, 32], strides = [1, 1]} : vector<1x128xf32> to vector<1x32xf32>
    %62 = arith.mulf %59, %27 : vector<1x32xf32>
    %63 = arith.mulf %58, %60 : vector<1x32xf32>
    %64 = arith.addf %62, %63 : vector<1x32xf32>
    %65 = math.tanh %64 : vector<1x32xf32>
    %66 = arith.mulf %61, %65 : vector<1x32xf32>
    %67 = tpu.concatenate %66, %47 in 1 : vector<1x32xf32>, vector<1x32xf32> -> vector<1x64xf32>
    %cst_22 = arith.constant dense<0.000000e+00> : vector<1x128xf32>
    %68 = tpu.matmul %67, %8, %cst_22 {dimension_numbers = #tpu.dot_dimension_numbers<[1], [0], [0], [1], [0, 0, 1, 1], [], []>} : vector<1x64xf32>, vector<64x128xf32>, vector<1x128xf32> -> vector<1x128xf32>
    %69 = arith.addf %68, %9 : vector<1x128xf32>
    %70 = arith.negf %69 : vector<1x128xf32>
    %71 = math.exp %70 : vector<1x128xf32>
    %cst_23 = arith.constant 1.000000e+00 : f32
    %72 = vector.broadcast %cst_23 : f32 to vector<1x128xf32>
    %73 = arith.addf %72, %71 : vector<1x128xf32>
    %74 = arith.divf %72, %73 : vector<1x128xf32>
    %75 = math.tanh %69 : vector<1x128xf32>
    %76 = vector.extract_strided_slice %74 {offsets = [0, 0], sizes = [1, 32], strides = [1, 1]} : vector<1x128xf32> to vector<1x32xf32>
    %77 = vector.extract_strided_slice %74 {offsets = [0, 32], sizes = [1, 32], strides = [1, 1]} : vector<1x128xf32> to vector<1x32xf32>
    %78 = vector.extract_strided_slice %75 {offsets = [0, 64], sizes = [1, 32], strides = [1, 1]} : vector<1x128xf32> to vector<1x32xf32>
    %79 = vector.extract_strided_slice %74 {offsets = [0, 96], sizes = [1, 32], strides = [1, 1]} : vector<1x128xf32> to vector<1x32xf32>
    %80 = arith.mulf %77, %45 : vector<1x32xf32>
    %81 = arith.mulf %76, %78 : vector<1x32xf32>
    %82 = arith.addf %80, %81 : vector<1x32xf32>
    %83 = math.tanh %82 : vector<1x32xf32>
    %84 = arith.mulf %79, %83 : vector<1x32xf32>
    %c2_i32 = arith.constant 2 : i32
    %85 = arith.index_cast %c2_i32 : i32 to index
    %c0_24 = arith.constant 0 : index
    %86 = vector.load %arg9[%85, %c0_24] : memref<8x128xf32, #tpu.memory_space<vmem>>, vector<1x128xf32>
    %cst_25 = arith.constant dense<0.000000e+00> : vector<1x128xf32>
    %87 = tpu.matmul %66, %7, %cst_25 {dimension_numbers = #tpu.dot_dimension_numbers<[1], [0], [0], [1], [0, 0, 1, 1], [], []>} : vector<1x32xf32>, vector<32x128xf32>, vector<1x128xf32> -> vector<1x128xf32>
    %88 = arith.addf %86, %87 : vector<1x128xf32>
    %89 = arith.negf %88 : vector<1x128xf32>
    %90 = math.exp %89 : vector<1x128xf32>
    %cst_26 = arith.constant 1.000000e+00 : f32
    %91 = vector.broadcast %cst_26 : f32 to vector<1x128xf32>
    %92 = arith.addf %91, %90 : vector<1x128xf32>
    %93 = arith.divf %91, %92 : vector<1x128xf32>
    %94 = math.tanh %88 : vector<1x128xf32>
    %95 = vector.extract_strided_slice %93 {offsets = [0, 0], sizes = [1, 32], strides = [1, 1]} : vector<1x128xf32> to vector<1x32xf32>
    %96 = vector.extract_strided_slice %93 {offsets = [0, 32], sizes = [1, 32], strides = [1, 1]} : vector<1x128xf32> to vector<1x32xf32>
    %97 = vector.extract_strided_slice %94 {offsets = [0, 64], sizes = [1, 32], strides = [1, 1]} : vector<1x128xf32> to vector<1x32xf32>
    %98 = vector.extract_strided_slice %93 {offsets = [0, 96], sizes = [1, 32], strides = [1, 1]} : vector<1x128xf32> to vector<1x32xf32>
    %99 = arith.mulf %96, %64 : vector<1x32xf32>
    %100 = arith.mulf %95, %97 : vector<1x32xf32>
    %101 = arith.addf %99, %100 : vector<1x32xf32>
    %102 = math.tanh %101 : vector<1x32xf32>
    %103 = arith.mulf %98, %102 : vector<1x32xf32>
    %104 = tpu.concatenate %103, %84 in 1 : vector<1x32xf32>, vector<1x32xf32> -> vector<1x64xf32>
    %cst_27 = arith.constant dense<0.000000e+00> : vector<1x128xf32>
    %105 = tpu.matmul %104, %8, %cst_27 {dimension_numbers = #tpu.dot_dimension_numbers<[1], [0], [0], [1], [0, 0, 1, 1], [], []>} : vector<1x64xf32>, vector<64x128xf32>, vector<1x128xf32> -> vector<1x128xf32>
    %106 = arith.addf %105, %9 : vector<1x128xf32>
    %107 = arith.negf %106 : vector<1x128xf32>
    %108 = math.exp %107 : vector<1x128xf32>
    %cst_28 = arith.constant 1.000000e+00 : f32
    %109 = vector.broadcast %cst_28 : f32 to vector<1x128xf32>
    %110 = arith.addf %109, %108 : vector<1x128xf32>
    %111 = arith.divf %109, %110 : vector<1x128xf32>
    %112 = math.tanh %106 : vector<1x128xf32>
    %113 = vector.extract_strided_slice %111 {offsets = [0, 0], sizes = [1, 32], strides = [1, 1]} : vector<1x128xf32> to vector<1x32xf32>
    %114 = vector.extract_strided_slice %111 {offsets = [0, 32], sizes = [1, 32], strides = [1, 1]} : vector<1x128xf32> to vector<1x32xf32>
    %115 = vector.extract_strided_slice %112 {offsets = [0, 64], sizes = [1, 32], strides = [1, 1]} : vector<1x128xf32> to vector<1x32xf32>
    %116 = vector.extract_strided_slice %111 {offsets = [0, 96], sizes = [1, 32], strides = [1, 1]} : vector<1x128xf32> to vector<1x32xf32>
    %117 = arith.mulf %114, %82 : vector<1x32xf32>
    %118 = arith.mulf %113, %115 : vector<1x32xf32>
    %119 = arith.addf %117, %118 : vector<1x32xf32>
    %120 = math.tanh %119 : vector<1x32xf32>
    %121 = arith.mulf %116, %120 : vector<1x32xf32>
    %c3_i32 = arith.constant 3 : i32
    %122 = arith.index_cast %c3_i32 : i32 to index
    %c0_29 = arith.constant 0 : index
    %123 = vector.load %arg9[%122, %c0_29] : memref<8x128xf32, #tpu.memory_space<vmem>>, vector<1x128xf32>
    %cst_30 = arith.constant dense<0.000000e+00> : vector<1x128xf32>
    %124 = tpu.matmul %103, %7, %cst_30 {dimension_numbers = #tpu.dot_dimension_numbers<[1], [0], [0], [1], [0, 0, 1, 1], [], []>} : vector<1x32xf32>, vector<32x128xf32>, vector<1x128xf32> -> vector<1x128xf32>
    %125 = arith.addf %123, %124 : vector<1x128xf32>
    %126 = arith.negf %125 : vector<1x128xf32>
    %127 = math.exp %126 : vector<1x128xf32>
    %cst_31 = arith.constant 1.000000e+00 : f32
    %128 = vector.broadcast %cst_31 : f32 to vector<1x128xf32>
    %129 = arith.addf %128, %127 : vector<1x128xf32>
    %130 = arith.divf %128, %129 : vector<1x128xf32>
    %131 = math.tanh %125 : vector<1x128xf32>
    %132 = vector.extract_strided_slice %130 {offsets = [0, 0], sizes = [1, 32], strides = [1, 1]} : vector<1x128xf32> to vector<1x32xf32>
    %133 = vector.extract_strided_slice %130 {offsets = [0, 32], sizes = [1, 32], strides = [1, 1]} : vector<1x128xf32> to vector<1x32xf32>
    %134 = vector.extract_strided_slice %131 {offsets = [0, 64], sizes = [1, 32], strides = [1, 1]} : vector<1x128xf32> to vector<1x32xf32>
    %135 = vector.extract_strided_slice %130 {offsets = [0, 96], sizes = [1, 32], strides = [1, 1]} : vector<1x128xf32> to vector<1x32xf32>
    %136 = arith.mulf %133, %101 : vector<1x32xf32>
    %137 = arith.mulf %132, %134 : vector<1x32xf32>
    %138 = arith.addf %136, %137 : vector<1x32xf32>
    %139 = math.tanh %138 : vector<1x32xf32>
    %140 = arith.mulf %135, %139 : vector<1x32xf32>
    %141 = tpu.concatenate %140, %121 in 1 : vector<1x32xf32>, vector<1x32xf32> -> vector<1x64xf32>
    %cst_32 = arith.constant dense<0.000000e+00> : vector<1x128xf32>
    %142 = tpu.matmul %141, %8, %cst_32 {dimension_numbers = #tpu.dot_dimension_numbers<[1], [0], [0], [1], [0, 0, 1, 1], [], []>} : vector<1x64xf32>, vector<64x128xf32>, vector<1x128xf32> -> vector<1x128xf32>
    %143 = arith.addf %142, %9 : vector<1x128xf32>
    %144 = arith.negf %143 : vector<1x128xf32>
    %145 = math.exp %144 : vector<1x128xf32>
    %cst_33 = arith.constant 1.000000e+00 : f32
    %146 = vector.broadcast %cst_33 : f32 to vector<1x128xf32>
    %147 = arith.addf %146, %145 : vector<1x128xf32>
    %148 = arith.divf %146, %147 : vector<1x128xf32>
    %149 = math.tanh %143 : vector<1x128xf32>
    %150 = vector.extract_strided_slice %148 {offsets = [0, 0], sizes = [1, 32], strides = [1, 1]} : vector<1x128xf32> to vector<1x32xf32>
    %151 = vector.extract_strided_slice %148 {offsets = [0, 32], sizes = [1, 32], strides = [1, 1]} : vector<1x128xf32> to vector<1x32xf32>
    %152 = vector.extract_strided_slice %149 {offsets = [0, 64], sizes = [1, 32], strides = [1, 1]} : vector<1x128xf32> to vector<1x32xf32>
    %153 = vector.extract_strided_slice %148 {offsets = [0, 96], sizes = [1, 32], strides = [1, 1]} : vector<1x128xf32> to vector<1x32xf32>
    %154 = arith.mulf %151, %119 : vector<1x32xf32>
    %155 = arith.mulf %150, %152 : vector<1x32xf32>
    %156 = arith.addf %154, %155 : vector<1x32xf32>
    %157 = math.tanh %156 : vector<1x32xf32>
    %158 = arith.mulf %153, %157 : vector<1x32xf32>
    %c4_i32 = arith.constant 4 : i32
    %159 = arith.index_cast %c4_i32 : i32 to index
    %c0_34 = arith.constant 0 : index
    %160 = vector.load %arg9[%159, %c0_34] : memref<8x128xf32, #tpu.memory_space<vmem>>, vector<1x128xf32>
    %cst_35 = arith.constant dense<0.000000e+00> : vector<1x128xf32>
    %161 = tpu.matmul %140, %7, %cst_35 {dimension_numbers = #tpu.dot_dimension_numbers<[1], [0], [0], [1], [0, 0, 1, 1], [], []>} : vector<1x32xf32>, vector<32x128xf32>, vector<1x128xf32> -> vector<1x128xf32>
    %162 = arith.addf %160, %161 : vector<1x128xf32>
    %163 = arith.negf %162 : vector<1x128xf32>
    %164 = math.exp %163 : vector<1x128xf32>
    %cst_36 = arith.constant 1.000000e+00 : f32
    %165 = vector.broadcast %cst_36 : f32 to vector<1x128xf32>
    %166 = arith.addf %165, %164 : vector<1x128xf32>
    %167 = arith.divf %165, %166 : vector<1x128xf32>
    %168 = math.tanh %162 : vector<1x128xf32>
    %169 = vector.extract_strided_slice %167 {offsets = [0, 0], sizes = [1, 32], strides = [1, 1]} : vector<1x128xf32> to vector<1x32xf32>
    %170 = vector.extract_strided_slice %167 {offsets = [0, 32], sizes = [1, 32], strides = [1, 1]} : vector<1x128xf32> to vector<1x32xf32>
    %171 = vector.extract_strided_slice %168 {offsets = [0, 64], sizes = [1, 32], strides = [1, 1]} : vector<1x128xf32> to vector<1x32xf32>
    %172 = vector.extract_strided_slice %167 {offsets = [0, 96], sizes = [1, 32], strides = [1, 1]} : vector<1x128xf32> to vector<1x32xf32>
    %173 = arith.mulf %170, %138 : vector<1x32xf32>
    %174 = arith.mulf %169, %171 : vector<1x32xf32>
    %175 = arith.addf %173, %174 : vector<1x32xf32>
    %176 = math.tanh %175 : vector<1x32xf32>
    %177 = arith.mulf %172, %176 : vector<1x32xf32>
    %178 = tpu.concatenate %177, %158 in 1 : vector<1x32xf32>, vector<1x32xf32> -> vector<1x64xf32>
    %cst_37 = arith.constant dense<0.000000e+00> : vector<1x128xf32>
    %179 = tpu.matmul %178, %8, %cst_37 {dimension_numbers = #tpu.dot_dimension_numbers<[1], [0], [0], [1], [0, 0, 1, 1], [], []>} : vector<1x64xf32>, vector<64x128xf32>, vector<1x128xf32> -> vector<1x128xf32>
    %180 = arith.addf %179, %9 : vector<1x128xf32>
    %181 = arith.negf %180 : vector<1x128xf32>
    %182 = math.exp %181 : vector<1x128xf32>
    %cst_38 = arith.constant 1.000000e+00 : f32
    %183 = vector.broadcast %cst_38 : f32 to vector<1x128xf32>
    %184 = arith.addf %183, %182 : vector<1x128xf32>
    %185 = arith.divf %183, %184 : vector<1x128xf32>
    %186 = math.tanh %180 : vector<1x128xf32>
    %187 = vector.extract_strided_slice %185 {offsets = [0, 0], sizes = [1, 32], strides = [1, 1]} : vector<1x128xf32> to vector<1x32xf32>
    %188 = vector.extract_strided_slice %185 {offsets = [0, 32], sizes = [1, 32], strides = [1, 1]} : vector<1x128xf32> to vector<1x32xf32>
    %189 = vector.extract_strided_slice %186 {offsets = [0, 64], sizes = [1, 32], strides = [1, 1]} : vector<1x128xf32> to vector<1x32xf32>
    %190 = vector.extract_strided_slice %185 {offsets = [0, 96], sizes = [1, 32], strides = [1, 1]} : vector<1x128xf32> to vector<1x32xf32>
    %191 = arith.mulf %188, %156 : vector<1x32xf32>
    %192 = arith.mulf %187, %189 : vector<1x32xf32>
    %193 = arith.addf %191, %192 : vector<1x32xf32>
    %194 = math.tanh %193 : vector<1x32xf32>
    %195 = arith.mulf %190, %194 : vector<1x32xf32>
    %c5_i32 = arith.constant 5 : i32
    %196 = arith.index_cast %c5_i32 : i32 to index
    %c0_39 = arith.constant 0 : index
    %197 = vector.load %arg9[%196, %c0_39] : memref<8x128xf32, #tpu.memory_space<vmem>>, vector<1x128xf32>
    %cst_40 = arith.constant dense<0.000000e+00> : vector<1x128xf32>
    %198 = tpu.matmul %177, %7, %cst_40 {dimension_numbers = #tpu.dot_dimension_numbers<[1], [0], [0], [1], [0, 0, 1, 1], [], []>} : vector<1x32xf32>, vector<32x128xf32>, vector<1x128xf32> -> vector<1x128xf32>
    %199 = arith.addf %197, %198 : vector<1x128xf32>
    %200 = arith.negf %199 : vector<1x128xf32>
    %201 = math.exp %200 : vector<1x128xf32>
    %cst_41 = arith.constant 1.000000e+00 : f32
    %202 = vector.broadcast %cst_41 : f32 to vector<1x128xf32>
    %203 = arith.addf %202, %201 : vector<1x128xf32>
    %204 = arith.divf %202, %203 : vector<1x128xf32>
    %205 = math.tanh %199 : vector<1x128xf32>
    %206 = vector.extract_strided_slice %204 {offsets = [0, 0], sizes = [1, 32], strides = [1, 1]} : vector<1x128xf32> to vector<1x32xf32>
    %207 = vector.extract_strided_slice %204 {offsets = [0, 32], sizes = [1, 32], strides = [1, 1]} : vector<1x128xf32> to vector<1x32xf32>
    %208 = vector.extract_strided_slice %205 {offsets = [0, 64], sizes = [1, 32], strides = [1, 1]} : vector<1x128xf32> to vector<1x32xf32>
    %209 = vector.extract_strided_slice %204 {offsets = [0, 96], sizes = [1, 32], strides = [1, 1]} : vector<1x128xf32> to vector<1x32xf32>
    %210 = arith.mulf %207, %175 : vector<1x32xf32>
    %211 = arith.mulf %206, %208 : vector<1x32xf32>
    %212 = arith.addf %210, %211 : vector<1x32xf32>
    %213 = math.tanh %212 : vector<1x32xf32>
    %214 = arith.mulf %209, %213 : vector<1x32xf32>
    %215 = tpu.concatenate %214, %195 in 1 : vector<1x32xf32>, vector<1x32xf32> -> vector<1x64xf32>
    %cst_42 = arith.constant dense<0.000000e+00> : vector<1x128xf32>
    %216 = tpu.matmul %215, %8, %cst_42 {dimension_numbers = #tpu.dot_dimension_numbers<[1], [0], [0], [1], [0, 0, 1, 1], [], []>} : vector<1x64xf32>, vector<64x128xf32>, vector<1x128xf32> -> vector<1x128xf32>
    %217 = arith.addf %216, %9 : vector<1x128xf32>
    %218 = arith.negf %217 : vector<1x128xf32>
    %219 = math.exp %218 : vector<1x128xf32>
    %cst_43 = arith.constant 1.000000e+00 : f32
    %220 = vector.broadcast %cst_43 : f32 to vector<1x128xf32>
    %221 = arith.addf %220, %219 : vector<1x128xf32>
    %222 = arith.divf %220, %221 : vector<1x128xf32>
    %223 = math.tanh %217 : vector<1x128xf32>
    %224 = vector.extract_strided_slice %222 {offsets = [0, 0], sizes = [1, 32], strides = [1, 1]} : vector<1x128xf32> to vector<1x32xf32>
    %225 = vector.extract_strided_slice %222 {offsets = [0, 32], sizes = [1, 32], strides = [1, 1]} : vector<1x128xf32> to vector<1x32xf32>
    %226 = vector.extract_strided_slice %223 {offsets = [0, 64], sizes = [1, 32], strides = [1, 1]} : vector<1x128xf32> to vector<1x32xf32>
    %227 = vector.extract_strided_slice %222 {offsets = [0, 96], sizes = [1, 32], strides = [1, 1]} : vector<1x128xf32> to vector<1x32xf32>
    %228 = arith.mulf %225, %193 : vector<1x32xf32>
    %229 = arith.mulf %224, %226 : vector<1x32xf32>
    %230 = arith.addf %228, %229 : vector<1x32xf32>
    %231 = math.tanh %230 : vector<1x32xf32>
    %232 = arith.mulf %227, %231 : vector<1x32xf32>
    %c6_i32 = arith.constant 6 : i32
    %233 = arith.index_cast %c6_i32 : i32 to index
    %c0_44 = arith.constant 0 : index
    %234 = vector.load %arg9[%233, %c0_44] : memref<8x128xf32, #tpu.memory_space<vmem>>, vector<1x128xf32>
    %cst_45 = arith.constant dense<0.000000e+00> : vector<1x128xf32>
    %235 = tpu.matmul %214, %7, %cst_45 {dimension_numbers = #tpu.dot_dimension_numbers<[1], [0], [0], [1], [0, 0, 1, 1], [], []>} : vector<1x32xf32>, vector<32x128xf32>, vector<1x128xf32> -> vector<1x128xf32>
    %236 = arith.addf %234, %235 : vector<1x128xf32>
    %237 = arith.negf %236 : vector<1x128xf32>
    %238 = math.exp %237 : vector<1x128xf32>
    %cst_46 = arith.constant 1.000000e+00 : f32
    %239 = vector.broadcast %cst_46 : f32 to vector<1x128xf32>
    %240 = arith.addf %239, %238 : vector<1x128xf32>
    %241 = arith.divf %239, %240 : vector<1x128xf32>
    %242 = math.tanh %236 : vector<1x128xf32>
    %243 = vector.extract_strided_slice %241 {offsets = [0, 0], sizes = [1, 32], strides = [1, 1]} : vector<1x128xf32> to vector<1x32xf32>
    %244 = vector.extract_strided_slice %241 {offsets = [0, 32], sizes = [1, 32], strides = [1, 1]} : vector<1x128xf32> to vector<1x32xf32>
    %245 = vector.extract_strided_slice %242 {offsets = [0, 64], sizes = [1, 32], strides = [1, 1]} : vector<1x128xf32> to vector<1x32xf32>
    %246 = vector.extract_strided_slice %241 {offsets = [0, 96], sizes = [1, 32], strides = [1, 1]} : vector<1x128xf32> to vector<1x32xf32>
    %247 = arith.mulf %244, %212 : vector<1x32xf32>
    %248 = arith.mulf %243, %245 : vector<1x32xf32>
    %249 = arith.addf %247, %248 : vector<1x32xf32>
    %250 = math.tanh %249 : vector<1x32xf32>
    %251 = arith.mulf %246, %250 : vector<1x32xf32>
    %252 = tpu.concatenate %251, %232 in 1 : vector<1x32xf32>, vector<1x32xf32> -> vector<1x64xf32>
    %cst_47 = arith.constant dense<0.000000e+00> : vector<1x128xf32>
    %253 = tpu.matmul %252, %8, %cst_47 {dimension_numbers = #tpu.dot_dimension_numbers<[1], [0], [0], [1], [0, 0, 1, 1], [], []>} : vector<1x64xf32>, vector<64x128xf32>, vector<1x128xf32> -> vector<1x128xf32>
    %254 = arith.addf %253, %9 : vector<1x128xf32>
    %255 = arith.negf %254 : vector<1x128xf32>
    %256 = math.exp %255 : vector<1x128xf32>
    %cst_48 = arith.constant 1.000000e+00 : f32
    %257 = vector.broadcast %cst_48 : f32 to vector<1x128xf32>
    %258 = arith.addf %257, %256 : vector<1x128xf32>
    %259 = arith.divf %257, %258 : vector<1x128xf32>
    %260 = math.tanh %254 : vector<1x128xf32>
    %261 = vector.extract_strided_slice %259 {offsets = [0, 0], sizes = [1, 32], strides = [1, 1]} : vector<1x128xf32> to vector<1x32xf32>
    %262 = vector.extract_strided_slice %259 {offsets = [0, 32], sizes = [1, 32], strides = [1, 1]} : vector<1x128xf32> to vector<1x32xf32>
    %263 = vector.extract_strided_slice %260 {offsets = [0, 64], sizes = [1, 32], strides = [1, 1]} : vector<1x128xf32> to vector<1x32xf32>
    %264 = vector.extract_strided_slice %259 {offsets = [0, 96], sizes = [1, 32], strides = [1, 1]} : vector<1x128xf32> to vector<1x32xf32>
    %265 = arith.mulf %262, %230 : vector<1x32xf32>
    %266 = arith.mulf %261, %263 : vector<1x32xf32>
    %267 = arith.addf %265, %266 : vector<1x32xf32>
    %268 = math.tanh %267 : vector<1x32xf32>
    %269 = arith.mulf %264, %268 : vector<1x32xf32>
    %c7_i32 = arith.constant 7 : i32
    %270 = arith.index_cast %c7_i32 : i32 to index
    %c0_49 = arith.constant 0 : index
    %271 = vector.load %arg9[%270, %c0_49] : memref<8x128xf32, #tpu.memory_space<vmem>>, vector<1x128xf32>
    %cst_50 = arith.constant dense<0.000000e+00> : vector<1x128xf32>
    %272 = tpu.matmul %251, %7, %cst_50 {dimension_numbers = #tpu.dot_dimension_numbers<[1], [0], [0], [1], [0, 0, 1, 1], [], []>} : vector<1x32xf32>, vector<32x128xf32>, vector<1x128xf32> -> vector<1x128xf32>
    %273 = arith.addf %271, %272 : vector<1x128xf32>
    %274 = arith.negf %273 : vector<1x128xf32>
    %275 = math.exp %274 : vector<1x128xf32>
    %cst_51 = arith.constant 1.000000e+00 : f32
    %276 = vector.broadcast %cst_51 : f32 to vector<1x128xf32>
    %277 = arith.addf %276, %275 : vector<1x128xf32>
    %278 = arith.divf %276, %277 : vector<1x128xf32>
    %279 = math.tanh %273 : vector<1x128xf32>
    %280 = vector.extract_strided_slice %278 {offsets = [0, 0], sizes = [1, 32], strides = [1, 1]} : vector<1x128xf32> to vector<1x32xf32>
    %281 = vector.extract_strided_slice %278 {offsets = [0, 32], sizes = [1, 32], strides = [1, 1]} : vector<1x128xf32> to vector<1x32xf32>
    %282 = vector.extract_strided_slice %279 {offsets = [0, 64], sizes = [1, 32], strides = [1, 1]} : vector<1x128xf32> to vector<1x32xf32>
    %283 = vector.extract_strided_slice %278 {offsets = [0, 96], sizes = [1, 32], strides = [1, 1]} : vector<1x128xf32> to vector<1x32xf32>
    %284 = arith.mulf %281, %249 : vector<1x32xf32>
    %285 = arith.mulf %280, %282 : vector<1x32xf32>
    %286 = arith.addf %284, %285 : vector<1x32xf32>
    %287 = math.tanh %286 : vector<1x32xf32>
    %288 = arith.mulf %283, %287 : vector<1x32xf32>
    %289 = tpu.concatenate %288, %269 in 1 : vector<1x32xf32>, vector<1x32xf32> -> vector<1x64xf32>
    %cst_52 = arith.constant dense<0.000000e+00> : vector<1x128xf32>
    %290 = tpu.matmul %289, %8, %cst_52 {dimension_numbers = #tpu.dot_dimension_numbers<[1], [0], [0], [1], [0, 0, 1, 1], [], []>} : vector<1x64xf32>, vector<64x128xf32>, vector<1x128xf32> -> vector<1x128xf32>
    %291 = arith.addf %290, %9 : vector<1x128xf32>
    %292 = arith.negf %291 : vector<1x128xf32>
    %293 = math.exp %292 : vector<1x128xf32>
    %cst_53 = arith.constant 1.000000e+00 : f32
    %294 = vector.broadcast %cst_53 : f32 to vector<1x128xf32>
    %295 = arith.addf %294, %293 : vector<1x128xf32>
    %296 = arith.divf %294, %295 : vector<1x128xf32>
    %297 = math.tanh %291 : vector<1x128xf32>
    %298 = vector.extract_strided_slice %296 {offsets = [0, 0], sizes = [1, 32], strides = [1, 1]} : vector<1x128xf32> to vector<1x32xf32>
    %299 = vector.extract_strided_slice %296 {offsets = [0, 32], sizes = [1, 32], strides = [1, 1]} : vector<1x128xf32> to vector<1x32xf32>
    %300 = vector.extract_strided_slice %297 {offsets = [0, 64], sizes = [1, 32], strides = [1, 1]} : vector<1x128xf32> to vector<1x32xf32>
    %301 = vector.extract_strided_slice %296 {offsets = [0, 96], sizes = [1, 32], strides = [1, 1]} : vector<1x128xf32> to vector<1x32xf32>
    %302 = arith.mulf %299, %267 : vector<1x32xf32>
    %303 = arith.mulf %298, %300 : vector<1x32xf32>
    %304 = arith.addf %302, %303 : vector<1x32xf32>
    %305 = math.tanh %304 : vector<1x32xf32>
    %306 = arith.mulf %301, %305 : vector<1x32xf32>
    %c8_i32 = arith.constant 8 : i32
    %c0_54 = arith.constant 0 : index
    %c0_55 = arith.constant 0 : index
    %307 = vector.load %arg6[%c0_54, %c0_55] : memref<32x4xf32, #tpu.memory_space<vmem>>, vector<32x4xf32>
    %cst_56 = arith.constant dense<0.000000e+00> : vector<1x4xf32>
    %308 = tpu.matmul %306, %307, %cst_56 {dimension_numbers = #tpu.dot_dimension_numbers<[1], [0], [0], [1], [0, 0, 1, 1], [], []>} : vector<1x32xf32>, vector<32x4xf32>, vector<1x4xf32> -> vector<1x4xf32>
    %c0_57 = arith.constant 0 : index
    %c0_58 = arith.constant 0 : index
    %309 = vector.load %arg7[%c0_57, %c0_58] : memref<1x4xf32, #tpu.memory_space<vmem>>, vector<1x4xf32>
    %310 = arith.addf %308, %309 : vector<1x4xf32>
    %c0_59 = arith.constant 0 : index
    %c0_60 = arith.constant 0 : index
    %311 = vector.load %arg8[%c0_59, %c0_60] : memref<1x4xf32, #tpu.memory_space<vmem>>, vector<1x4xf32>
    tpu.vector_store %arg8[%c0_59, %c0_60], %310 {strides = array<i32>} : memref<1x4xf32, #tpu.memory_space<vmem>>, vector<1x4xf32>,
    return
  }
}

</mosaic_0001>

<bundles_post_ra>
// kernel: tpu_custom_call.1
= control target key start
LH: loop header
LB: loop body
LE: loop exit
PB: predicated region body
PF: predicated region fallthrough
CT: control target
= control target key end

     0   :  { %13 = vsyncpa [#allocation4], 0  ;;  %s1857_s0 = inlined_call_operand.hbm [shape: f32[8,16], index: 0, kind: input, shape index: {}]   ;;  %s1858_s1 = inlined_call_operand.hbm [shape: f32[16,128], index: 1, kind: input, shape index: {}]   ;;  %s1859_s2 = inlined_call_operand.vmem [shape: f32[32,128], index: 2, kind: input, shape index: {}]   ;;  %s1860_s3 = inlined_call_operand.vmem [shape: f32[1,128], index: 3, kind: input, shape index: {}]   ;;  %s1861_s4 = inlined_call_operand.hbm [shape: f32[64,128], index: 4, kind: input, shape index: {}]   ;;  %s1862_s5 = inlined_call_operand.vmem [shape: f32[1,128], index: 5, kind: input, shape index: {}]   ;;  %s1863_s6 = inlined_call_operand.vmem [shape: f32[32,4], index: 6, kind: input, shape index: {}]   ;;  %s1864_s7 = inlined_call_operand.vmem [shape: f32[1,4], index: 7, kind: input, shape index: {}]   ;;  %s1865_s8 = inlined_call_operand.hbm [shape: f32[1,4], index: 8, kind: output, shape index: {}]  }
   0x1   :  { %14 = vsyncpa [#allocation7], 0  ;;  %s31_s29 = sshll.u32 %s1858_s1, 4  ;;  %s32_s29 = int_to_ptr.hbm [resolvable:$true] %s31_s29 }
   0x2   :  { %15 = vsyncpa [#allocation5], 0  ;;  %s1483_s30 = smov [#allocation6]   ;;  %s21_s12 = sshll.u32 %s1857_s0, 4  ;;  %s22_s12 = int_to_ptr.hbm [resolvable:$true] %s21_s12 }
   0x3   :  { %s33_s9 = sshll.u32 %s1483_s30, 4  ;;  %s1484_s13 = smov 128   ;;  %s34_s9 = int_to_ptr.vmem [resolvable:$true] %s33_s9 }
   0x4   :  { %s1485_s14 = smov 8   ;;  %s1486_s15 = smov [#allocation3]  }
   0x5   :  { %39 = dma.hbm_to_vmem [thread:$0]  %s32_s29, 256, %s34_s9, [#allocation7], %s1484_s13, %s1484_s13, %s1485_s14  }
   0x6   :  { %s23_s16 = sshll.u32 %s1486_s15, 4  ;;  %s48_s19 = sshll.u32 %s1861_s4, 4  ;;  %s24_s16 = int_to_ptr.vmem [resolvable:$true] %s23_s16  ;;  %s49_s19 = int_to_ptr.hbm [resolvable:$true] %s48_s19 }
   0x7   :  { %26 = dma.hbm_to_vmem [thread:$0]  %s22_s12, 128, %s24_s16, [#allocation4]  }
   0x8   :  { %s1487_s1 = smov [#allocation8]  }
   0x9   :  { %s50_s20 = sshll.u32 %s1487_s1, 4  ;;  %s51_s20 = int_to_ptr.vmem [resolvable:$true] %s50_s20 }
   0xa   :  { %56 = dma.hbm_to_vmem [thread:$0]  %s49_s19, 1024, %s51_s20, [#allocation7], %s1484_s13, %s1484_s13, %s1485_s14  }
   0xb   :  { %1477 = dma.done.wait [#allocation4], 128  }
   0xc   :  { %1478 = vsyncadd [#allocation4], 4294967168 }
   0xd   :  { %1479 = dma.done.wait [#allocation7], 1280  }
   0xe   :  { %1480 = vsyncadd [#allocation7], 4294966016  ;;  %v77_v0 = vld [vmem:[#allocation6 + $0x8] sm:$0xff]  ;;  %v76_v1 = vld [vmem:[#allocation6] sm:$0xff]  ;;  %vm82_vm0 = vcmask 130048   ;;  %v1488_v7 = vmov 0.0  }
   0xf   :  { %100 = vmatpush.msra.mxu0 %v77_v0  ;;  %v75_v2 = vld [vmem:[#allocation3] sm:$0xff]  ;;  %v1549_v3 = vld [vmem:[%s1859_s2 + $0x18] sm:$0xff]  ;;  %v1554_v4 = vld [vmem:[%s1859_s2 + $0x10] sm:$0xff]  ;;  %s1489_s28 = smov 64   ;;  %vm121_vm5 = vcmask 261120   ;;  %vm188_vm6 = vcmask 523264  }
  0x10   :  { %137 = vmatpush.msra.mxu1 %v1549_v3  ;;  %264 = vmatpush.msra.mxu3 %v1549_v3  ;;  %v1561_v5 = vld [vmem:[%s1859_s2 + $0x8] sm:$0xff]  ;;  %v1567_v6 = vld [vmem:[%s1859_s2] sm:$0xff]  ;;  %v1591_v34 = vld [vmem:[#allocation8 + $0x38] sm:$0xff]  ;;  %s1491_s1 = smov [#allocation9]   ;;  %s1198_s4 = sshll.u32 %s1865_s8, 4  ;;  %s1199_s4 = int_to_ptr.hbm [resolvable:$true] %s1198_s4 }
  0x11   :  { %101 = vmatpush.msra.mxu0 %v76_v1  ;;  %v1251_v8 = vld [vmem:[%s1860_s3] ss:$0 sm:$0xff]  ;;  %s1490_s3 = smov 32   ;;  %v1593_v35 = vld [vmem:[#allocation8 + $0x30] sm:$0xff]  ;;  %200 = vmatpush.msra.mxu2 %v1591_v34  ;;  %v1597_v36 = vld [vmem:[#allocation8 + $0x28] sm:$0xff]  ;;  %s1196_s20 = sshll.u32 %s1491_s1, 4  ;;  %s1197_s20 = int_to_ptr.vmem [resolvable:$true] %s1196_s20 }
  0x12   :  { %1209 = vmatmul.msk.f32.vlgmr.msra.gmra.mxu0 %vm82_vm0, %v75_v2  ;;  %138 = vmatpush.msra.mxu1 %v1554_v4  ;;  %v1602_v37 = vld [vmem:[#allocation8 + $0x20] sm:$0xff]  ;;  %v1607_v38 = vld [vmem:[#allocation8 + $0x18] sm:$0xff]  ;;  %v1612_v39 = vld [vmem:[#allocation8 + $0x10] sm:$0xff] }
  0x13   :  { %265 = vmatpush.msra.mxu3 %v1554_v4  ;;  %330 = vmatpush.msrb.mxu0 %v1591_v34  ;;  %v1617_v40 = vld [vmem:[#allocation8 + $0x8] sm:$0xff]  ;;  %v1627_v43 = vld [vmem:[#allocation8] sm:$0xff] }
  0x14   :  { %139 = vmatpush.msra.mxu1 %v1561_v5  ;;  %201 = vmatpush.msra.mxu2 %v1593_v35  ;;  %v1658_v46 = vld [vmem:[%s1862_s5] sm:$0x1] }
  0x15   :  { %266 = vmatpush.msra.mxu3 %v1561_v5  ;;  %331 = vmatpush.msrb.mxu0 %v1593_v35 }
  0x16   :  { %140 = vmatpush.msra.mxu1 %v1567_v6  ;;  %202 = vmatpush.msra.mxu2 %v1597_v36 }
  0x17   :  { %141 = vmatmul.f32.vlgmr.msra.gmra.mxu1 %v1488_v7  ;;  %267 = vmatpush.msra.mxu3 %v1567_v6 }
  0x18   :  { %394 = vmatpush.msrb.mxu1 %v1549_v3  ;;  %332 = vmatpush.msrb.mxu0 %v1597_v36 }
  0x19   :  { %460 = vmatpush.msrb.mxu3 %v1591_v34  ;;  %203 = vmatpush.msra.mxu2 %v1602_v37 }
  0x1a   :  { %395 = vmatpush.msrb.mxu1 %v1554_v4  ;;  %333 = vmatpush.msrb.mxu0 %v1602_v37 }
  0x1b   :  { %461 = vmatpush.msrb.mxu3 %v1593_v35  ;;  %204 = vmatpush.msra.mxu2 %v1607_v38 }
  0x1c   :  { %396 = vmatpush.msrb.mxu1 %v1561_v5  ;;  %334 = vmatpush.msrb.mxu0 %v1607_v38 }
  0x1d   :  { %462 = vmatpush.msrb.mxu3 %v1597_v36  ;;  %205 = vmatpush.msra.mxu2 %v1612_v39 }
  0x1e   :  { %397 = vmatpush.msrb.mxu1 %v1567_v6  ;;  %335 = vmatpush.msrb.mxu0 %v1612_v39 }
  0x1f   :  { %463 = vmatpush.msrb.mxu3 %v1602_v37  ;;  %206 = vmatpush.msra.mxu2 %v1617_v40 }
  0x20   :  { %524 = vmatpush.msra.mxu1 %v1549_v3  ;;  %336 = vmatpush.msrb.mxu0 %v1617_v40 }
  0x21   :  { %464 = vmatpush.msrb.mxu3 %v1607_v38  ;;  %207 = vmatpush.msra.mxu2 %v1627_v43 }
  0x22   :  { %525 = vmatpush.msra.mxu1 %v1554_v4  ;;  %337 = vmatpush.msrb.mxu0 %v1627_v43 }
  0x23   :  { %465 = vmatpush.msrb.mxu3 %v1612_v39  ;;  %590 = vmatpush.msrb.mxu2 %v1591_v34 }
  0x24   :  { %526 = vmatpush.msra.mxu1 %v1561_v5  ;;  %654 = vmatpush.msra.mxu0 %v1549_v3 }
  0x25   :  { %466 = vmatpush.msrb.mxu3 %v1617_v40  ;;  %591 = vmatpush.msrb.mxu2 %v1593_v35 }
  0x26   :  { %527 = vmatpush.msra.mxu1 %v1567_v6  ;;  %655 = vmatpush.msra.mxu0 %v1554_v4 }
  0x27   :  { %467 = vmatpush.msrb.mxu3 %v1627_v43  ;;  %592 = vmatpush.msrb.mxu2 %v1597_v36 }
  0x28   :  { %656 = vmatpush.msra.mxu0 %v1561_v5 }
  0x29   :  { %593 = vmatpush.msrb.mxu2 %v1602_v37 }
  0x2a   :  { %657 = vmatpush.msra.mxu0 %v1567_v6 }
  0x2b   :  { %594 = vmatpush.msrb.mxu2 %v1607_v38 }
  0x2d   :  { %595 = vmatpush.msrb.mxu2 %v1612_v39 }
  0x2f   :  { %596 = vmatpush.msrb.mxu2 %v1617_v40 }
  0x31   :  { %597 = vmatpush.msrb.mxu2 %v1627_v43 }
  0x8f   :  { %v103_v9 = vpop.f32.mrf.mxu0 }
  0x90   :  { %v104_v10 = vadd.f32 %v1251_v8, %v103_v9 }
  0x92   :  { %106 = vst [vmem:[#allocation2] sm:$0xff] %v104_v10 }
  0x94   :  { %v142_v11 = vpop.f32.mrf.mxu1 }
  0x99   :  { %v120_v12 = vld [vmem:[#allocation2] sm:$0x1]  ;;  %v249_v50 = vld [vmem:[#allocation2 + $0x1] sm:$0x1] }
  0x9a   :  { %v145_v13 = vadd.f32 %v142_v11, %v120_v12 }
  0x9c   :  { %1252 = vtanh.f32 %v145_v13  ;;  %v1210_v15 = vmul.f32 -1.442695, %v145_v13 }
  0x9e   :  { %1254 = vpow2.f32 %v1210_v15 }
  0xa2   :  { %v1253_v14 = vpop.eup %1252 }
  0xa3   :  { %168 = vrot.lane.b32.xlu0 %v1253_v14, %s1489_s28 }
  0xa4   :  { %v1255_v16 = vpop.eup %1254 }
  0xa5   :  { %v149_v17 = vadd.f32 1.0, %v1255_v16 }
  0xa7   :  { %1256 = vrcp.f32 %v149_v17  ;;  %v161_v23 = vand.u32 2147483648, %v149_v17  ;;  %vm155_vm2 = vweird.f32 %v149_v17  ;;  %v159_v24 = vand.u32 2147483647, %v149_v17 }
  0xa9   :  { %v162_v26 = vor.u32 1.1754944e-38, %v161_v23  ;;  %vm160_vm4 = vcmp.eq.f32.partialorder %v159_v24, 8.507059e+37 }
  0xad   :  { %v1257_v18 = vpop.eup %1256 }
  0xae   :  { %v151_v19 = vmul.f32 %v1257_v18, %v149_v17  ;;  %vm156_vm1 = vweird.f32 %v1257_v18 }
  0xaf   :  { %vm157_vm3 = vmor %vm155_vm2, %vm156_vm1 }
  0xb0   :  { %v152_v20 = vsub.f32 1.0, %v151_v19 }
  0xb2   :  { %v153_v21 = vmul.f32 %v1257_v18, %v152_v20 }
  0xb4   :  { %v154_v22 = vadd.f32 %v1257_v18, %v153_v21 }
  0xb6   :  { %v158_v25 = vsel %vm157_vm3, %v1257_v18, %v154_v22 }
  0xb7   :  { %v163_v28 = vsel %vm160_vm4, %v162_v26, %v158_v25 }
  0xb8   :  { %v166_v30 = vmul.f32 0.0, %v163_v28 }
 0x115   :  { %v169_v27 = vpop.permute.xlu0 %168 }
 0x116   :  { %v171_v29 = vmul.f32 %v169_v27, %v163_v28 }
 0x118   :  { %173 = vrot.lane.b32.xlu0 %v171_v29, %s1490_s3 }
 0x18a   :  { %v174_v31 = vpop.permute.xlu0 %173 }
 0x18b   :  { %v1587_v32 = vadd.f32 %v174_v31, %v166_v30 }
 0x18d   :  { %1258 = vtanh.f32 %v1587_v32 }
 0x193   :  { %v1259_v33 = vpop.eup %1258 }
 0x194   :  { %179 = vrot.lane.b32.xlu1 %v1259_v33, %s1489_s28 }
 0x206   :  { %v180_v41 = vpop.permute.xlu1 %179 }
 0x207   :  { %v182_v42 = vmul.f32 %v180_v41, %v163_v28 }
 0x209   :  { %184 = vrot.lane.b32.xlu1 %v182_v42, %s1490_s3 }
 0x27b   :  { %v185_v44 = vpop.permute.xlu1 %184 }
 0x27c   :  { %1213 = vmatmul.msk.f32.vlgmr.msra.gmra.mxu3 %vm121_vm5, %v185_v44  ;;  %v187_v45 = vsel %vm121_vm5, %v185_v44, 0.0 }
 0x27d   :  { %1211 = vmatmul.msk.f32.vlgmr.msra.gmra.mxu2 %vm188_vm6, %v187_v45  ;;  %784 = vmatpush.msra.mxu3 %v1549_v3 }
 0x27e   :  { %914 = vmatpush.msra.mxu2 %v1549_v3 }
 0x27f   :  { %785 = vmatpush.msra.mxu3 %v1554_v4 }
 0x280   :  { %915 = vmatpush.msra.mxu2 %v1554_v4 }
 0x281   :  { %786 = vmatpush.msra.mxu3 %v1561_v5 }
 0x282   :  { %916 = vmatpush.msra.mxu2 %v1561_v5 }
 0x283   :  { %787 = vmatpush.msra.mxu3 %v1567_v6 }
 0x284   :  { %917 = vmatpush.msra.mxu2 %v1567_v6 }
 0x2ff   :  { %v269_v49 = vpop.f32.mrf.mxu3 }
 0x300   :  { %v209_v47 = vpop.f32.mrf.mxu2  ;;  %v272_v51 = vadd.f32 %v269_v49, %v249_v50 }
 0x301   :  { %v210_v48 = vadd.f32 %v209_v47, %v1658_v46 }
 0x302   :  { %v1214_v55 = vmul.f32 -1.442695, %v272_v51 }
 0x303   :  { %1260 = vtanh.f32 %v210_v48  ;;  %v1212_v54 = vmul.f32 -1.442695, %v210_v48  ;;  %v379_v48 = vld [vmem:[#allocation2 + $0x2] sm:$0x1] }
 0x304   :  { %1262 = vtanh.f32 %v272_v51 }
 0x305   :  { %1264 = vpow2.f32 %v1212_v54 }
 0x306   :  { %1266 = vpow2.f32 %v1214_v55 }
 0x309   :  { %v1261_v52 = vpop.eup %1260 }
 0x30a   :  { %234 = vrot.lane.b32.xlu2 %v1261_v52, %s1489_s28  ;;  %v1263_v53 = vpop.eup %1262 }
 0x30b   :  { %v1265_v56 = vpop.eup %1264 }
 0x30c   :  { %v215_v57 = vadd.f32 1.0, %v1265_v56  ;;  %v1267_v58 = vpop.eup %1266 }
 0x30d   :  { %v276_v59 = vadd.f32 1.0, %v1267_v58 }
 0x30e   :  { %1268 = vrcp.f32 %v215_v57  ;;  %v227_v8 = vand.u32 2147483648, %v215_v57  ;;  %vm221_vm8 = vweird.f32 %v215_v57  ;;  %v225_v9 = vand.u32 2147483647, %v215_v57 }
 0x30f   :  { %1270 = vrcp.f32 %v276_v59  ;;  %v288_v17 = vand.u32 2147483648, %v276_v59  ;;  %vm282_vm12 = vweird.f32 %v276_v59  ;;  %v286_v18 = vand.u32 2147483647, %v276_v59 }
 0x310   :  { %v228_v12 = vor.u32 1.1754944e-38, %v227_v8  ;;  %vm226_vm10 = vcmp.eq.f32.partialorder %v225_v9, 8.507059e+37 }
 0x311   :  { %v289_v20 = vor.u32 1.1754944e-38, %v288_v17  ;;  %vm287_vm14 = vcmp.eq.f32.partialorder %v286_v18, 8.507059e+37 }
 0x312   :  { %295 = vrot.lane.b32.xlu2 %v1263_v53, %s1489_s28 }
 0x314   :  { %v1269_v60 = vpop.eup %1268 }
 0x315   :  { %v217_v61 = vmul.f32 %v1269_v60, %v215_v57  ;;  %v1271_v63 = vpop.eup %1270  ;;  %vm222_vm7 = vweird.f32 %v1269_v60 }
 0x316   :  { %v278_v1 = vmul.f32 %v1271_v63, %v276_v59  ;;  %vm223_vm9 = vmor %vm221_vm8, %vm222_vm7  ;;  %vm283_vm11 = vweird.f32 %v1271_v63 }
 0x317   :  { %v218_v62 = vsub.f32 1.0, %v217_v61  ;;  %vm284_vm13 = vmor %vm282_vm12, %vm283_vm11 }
 0x318   :  { %v279_v7 = vsub.f32 1.0, %v278_v1 }
 0x319   :  { %v219_v0 = vmul.f32 %v1269_v60, %v218_v62 }
 0x31a   :  { %v280_v11 = vmul.f32 %v1271_v63, %v279_v7 }
 0x31b   :  { %v220_v2 = vadd.f32 %v1269_v60, %v219_v0 }
 0x31c   :  { %v281_v16 = vadd.f32 %v1271_v63, %v280_v11 }
 0x31d   :  { %v224_v10 = vsel %vm223_vm9, %v1269_v60, %v220_v2 }
 0x31e   :  { %v229_v14 = vsel %vm226_vm10, %v228_v12, %v224_v10  ;;  %v285_v19 = vsel %vm284_vm13, %v1271_v63, %v281_v16 }
 0x31f   :  { %v290_v21 = vsel %vm287_vm14, %v289_v20, %v285_v19  ;;  %v232_v24 = vmul.f32 0.0, %v229_v14 }
 0x320   :  { %v293_v27 = vmul.f32 %v290_v21, %v1587_v32 }
 0x364   :  { %v235_v13 = vpop.permute.xlu2 %234 }
 0x365   :  { %v237_v15 = vmul.f32 %v235_v13, %v229_v14 }
 0x367   :  { %239 = vrot.lane.b32.xlu0 %v237_v15, %s1490_s3 }
 0x36c   :  { %v296_v22 = vpop.permute.xlu2 %295 }
 0x36d   :  { %v298_v23 = vmul.f32 %v296_v22, %v290_v21 }
 0x36f   :  { %300 = vrot.lane.b32.xlu1 %v298_v23, %s1490_s3 }
 0x3d9   :  { %v240_v25 = vpop.permute.xlu0 %239 }
 0x3da   :  { %v1665_v26 = vadd.f32 %v240_v25, %v232_v24 }
 0x3dc   :  { %1272 = vtanh.f32 %v1665_v26 }
 0x3e1   :  { %v301_v28 = vpop.permute.xlu1 %300 }
 0x3e2   :  { %v1273_v29 = vpop.eup %1272  ;;  %v1669_v30 = vadd.f32 %v301_v28, %v293_v27 }
 0x3e3   :  { %245 = vrot.lane.b32.xlu2 %v1273_v29, %s1489_s28 }
 0x3e4   :  { %1274 = vtanh.f32 %v1669_v30 }
 0x3ea   :  { %v1275_v31 = vpop.eup %1274 }
 0x3eb   :  { %306 = vrot.lane.b32.xlu0 %v1275_v31, %s1489_s28 }
 0x43d   :  { %v246_v33 = vpop.permute.xlu2 %245 }
 0x43e   :  { %v248_v41 = vmul.f32 %v246_v33, %v229_v14 }
 0x440   :  { %315 = vrot.lane.b32.xlu2 %v248_v41, %s1489_s28 }
 0x45d   :  { %v307_v42 = vpop.permute.xlu0 %306 }
 0x45e   :  { %v309_v44 = vmul.f32 %v307_v42, %v290_v21 }
 0x460   :  { %311 = vrot.lane.b32.xlu1 %v309_v44, %s1490_s3 }
 0x49a   :  { %v316_v32 = vpop.permute.xlu2 %315 }
 0x4d2   :  { %v312_v45 = vpop.permute.xlu1 %311 }
 0x4d3   :  { %v318_v47 = vsel %vm121_vm5, %v312_v45, %v316_v32  ;;  %1217 = vmatmul.msk.f32.vlgmr.msrb.gmra.mxu1 %vm121_vm5, %v312_v45 }
 0x4d4   :  { %1215 = vmatmul.msk.f32.vlgmr.msrb.gmra.mxu0 %vm188_vm6, %v318_v47  ;;  %720 = vmatpush.msrb.mxu1 %v1591_v34 }
 0x4d5   :  { %850 = vmatpush.msrb.mxu0 %v1591_v34 }
 0x4d6   :  { %721 = vmatpush.msrb.mxu1 %v1593_v35 }
 0x4d7   :  { %851 = vmatpush.msrb.mxu0 %v1593_v35 }
 0x4d8   :  { %722 = vmatpush.msrb.mxu1 %v1597_v36 }
 0x4d9   :  { %852 = vmatpush.msrb.mxu0 %v1597_v36 }
 0x4da   :  { %723 = vmatpush.msrb.mxu1 %v1602_v37 }
 0x4db   :  { %853 = vmatpush.msrb.mxu0 %v1602_v37 }
 0x4dc   :  { %724 = vmatpush.msrb.mxu1 %v1607_v38 }
 0x4dd   :  { %854 = vmatpush.msrb.mxu0 %v1607_v38 }
 0x4de   :  { %725 = vmatpush.msrb.mxu1 %v1612_v39 }
 0x4df   :  { %855 = vmatpush.msrb.mxu0 %v1612_v39 }
 0x4e0   :  { %726 = vmatpush.msrb.mxu1 %v1617_v40 }
 0x4e1   :  { %856 = vmatpush.msrb.mxu0 %v1617_v40 }
 0x4e2   :  { %727 = vmatpush.msrb.mxu1 %v1627_v43 }
 0x4e3   :  { %857 = vmatpush.msrb.mxu0 %v1627_v43 }
 0x550   :  { %v399_v49 = vpop.f32.mrf.mxu1 }
 0x551   :  { %v402_v50 = vadd.f32 %v399_v49, %v379_v48  ;;  %v339_v51 = vpop.f32.mrf.mxu0 }
 0x552   :  { %v340_v52 = vadd.f32 %v339_v51, %v1658_v46 }
 0x553   :  { %1276 = vtanh.f32 %v402_v50  ;;  %v1218_v55 = vmul.f32 -1.442695, %v402_v50 }
 0x554   :  { %1278 = vtanh.f32 %v340_v52  ;;  %v1216_v56 = vmul.f32 -1.442695, %v340_v52 }
 0x555   :  { %1280 = vpow2.f32 %v1218_v55 }
 0x556   :  { %1282 = vpow2.f32 %v1216_v56 }
 0x559   :  { %v1277_v53 = vpop.eup %1276 }
 0x55a   :  { %v1279_v54 = vpop.eup %1278  ;;  %425 = vrot.lane.b32.xlu1 %v1277_v53, %s1489_s28 }
 0x55b   :  { %364 = vrot.lane.b32.xlu0 %v1279_v54, %s1489_s28  ;;  %v1281_v57 = vpop.eup %1280 }
 0x55c   :  { %v1283_v58 = vpop.eup %1282  ;;  %v406_v59 = vadd.f32 1.0, %v1281_v57 }
 0x55d   :  { %v345_v60 = vadd.f32 1.0, %v1283_v58 }
 0x55e   :  { %1284 = vrcp.f32 %v406_v59  ;;  %v418_v10 = vand.u32 2147483648, %v406_v59  ;;  %vm412_vm1 = vweird.f32 %v406_v59  ;;  %v416_v12 = vand.u32 2147483647, %v406_v59 }
 0x55f   :  { %1286 = vrcp.f32 %v345_v60  ;;  %v357_v13 = vand.u32 2147483648, %v345_v60  ;;  %vm351_vm3 = vweird.f32 %v345_v60  ;;  %v355_v14 = vand.u32 2147483647, %v345_v60 }
 0x560   :  { %v419_v16 = vor.u32 1.1754944e-38, %v418_v10  ;;  %vm417_vm7 = vcmp.eq.f32.partialorder %v416_v12, 8.507059e+37 }
 0x561   :  { %v358_v18 = vor.u32 1.1754944e-38, %v357_v13  ;;  %vm356_vm8 = vcmp.eq.f32.partialorder %v355_v14, 8.507059e+37 }
 0x564   :  { %v1285_v61 = vpop.eup %1284 }
 0x565   :  { %v1287_v62 = vpop.eup %1286  ;;  %v408_v63 = vmul.f32 %v1285_v61, %v406_v59  ;;  %vm413_vm15 = vweird.f32 %v1285_v61 }
 0x566   :  { %v347_v0 = vmul.f32 %v1287_v62, %v345_v60  ;;  %vm352_vm0 = vweird.f32 %v1287_v62  ;;  %vm414_vm2 = vmor %vm412_vm1, %vm413_vm15 }
 0x567   :  { %v409_v1 = vsub.f32 1.0, %v408_v63  ;;  %vm353_vm4 = vmor %vm351_vm3, %vm352_vm0 }
 0x568   :  { %v348_v2 = vsub.f32 1.0, %v347_v0 }
 0x569   :  { %v410_v7 = vmul.f32 %v1285_v61, %v409_v1 }
 0x56a   :  { %v349_v8 = vmul.f32 %v1287_v62, %v348_v2 }
 0x56b   :  { %v411_v9 = vadd.f32 %v1285_v61, %v410_v7 }
 0x56c   :  { %v350_v11 = vadd.f32 %v1287_v62, %v349_v8 }
 0x56d   :  { %v415_v15 = vsel %vm414_vm2, %v1285_v61, %v411_v9 }
 0x56e   :  { %v354_v17 = vsel %vm353_vm4, %v1287_v62, %v350_v11  ;;  %v420_v20 = vsel %vm417_vm7, %v419_v16, %v415_v15 }
 0x56f   :  { %v359_v23 = vsel %vm356_vm8, %v358_v18, %v354_v17  ;;  %v423_v31 = vmul.f32 %v420_v20, %v1669_v30 }
 0x570   :  { %v362_v25 = vmul.f32 %v359_v23, %v1665_v26 }
 0x5cc   :  { %v426_v19 = vpop.permute.xlu1 %425 }
 0x5cd   :  { %v428_v21 = vmul.f32 %v426_v19, %v420_v20  ;;  %v365_v22 = vpop.permute.xlu0 %364 }
 0x5ce   :  { %v367_v24 = vmul.f32 %v365_v22, %v359_v23 }
 0x5cf   :  { %430 = vrot.lane.b32.xlu0 %v428_v21, %s1490_s3 }
 0x5d0   :  { %369 = vrot.lane.b32.xlu2 %v367_v24, %s1490_s3 }
 0x62a   :  { %v370_v27 = vpop.permute.xlu2 %369 }
 0x62b   :  { %v1701_v28 = vadd.f32 %v370_v27, %v362_v25 }
 0x62d   :  { %1288 = vtanh.f32 %v1701_v28 }
 0x633   :  { %v1289_v29 = vpop.eup %1288 }
 0x634   :  { %375 = vrot.lane.b32.xlu1 %v1289_v29, %s1489_s28 }
 0x641   :  { %v431_v33 = vpop.permute.xlu0 %430 }
 0x642   :  { %v1706_v41 = vadd.f32 %v431_v33, %v423_v31 }
 0x644   :  { %1290 = vtanh.f32 %v1706_v41 }
 0x64a   :  { %v1291_v42 = vpop.eup %1290 }
 0x64b   :  { %436 = vrot.lane.b32.xlu2 %v1291_v42, %s1489_s28 }
 0x6a5   :  { %v437_v44 = vpop.permute.xlu2 %436 }
 0x6a6   :  { %v439_v26 = vmul.f32 %v437_v44, %v420_v20  ;;  %v376_v32 = vpop.permute.xlu1 %375 }
 0x6a7   :  { %v378_v45 = vmul.f32 %v376_v32, %v359_v23 }
 0x6a8   :  { %441 = vrot.lane.b32.xlu0 %v439_v26, %s1490_s3 }
 0x6a9   :  { %445 = vrot.lane.b32.xlu1 %v378_v45, %s1489_s28 }
 0x71a   :  { %v442_v47 = vpop.permute.xlu0 %441 }
 0x71b   :  { %1221 = vmatmul.msk.f32.vlgmr.msra.gmra.mxu1 %vm121_vm5, %v442_v47  ;;  %v446_v30 = vpop.permute.xlu1 %445 }
 0x71c   :  { %v448_v48 = vsel %vm121_vm5, %v442_v47, %v446_v30  ;;  %1044 = vmatpush.msra.mxu1 %v1549_v3  ;;  %v509_v3 = vld [vmem:[#allocation2 + $0x3] sm:$0x1]  ;;  %v639_v47 = vld [vmem:[#allocation2 + $0x4] sm:$0x1] }
 0x71d   :  { %1219 = vmatmul.msk.f32.vlgmr.msrb.gmra.mxu3 %vm188_vm6, %v448_v48 }
 0x71e   :  { %1045 = vmatpush.msra.mxu1 %v1554_v4  ;;  %980 = vmatpush.msrb.mxu3 %v1591_v34 }
 0x720   :  { %1046 = vmatpush.msra.mxu1 %v1561_v5  ;;  %981 = vmatpush.msrb.mxu3 %v1593_v35 }
 0x722   :  { %1047 = vmatpush.msra.mxu1 %v1567_v6  ;;  %982 = vmatpush.msrb.mxu3 %v1597_v36 }
 0x724   :  { %983 = vmatpush.msrb.mxu3 %v1602_v37 }
 0x726   :  { %984 = vmatpush.msrb.mxu3 %v1607_v38 }
 0x728   :  { %985 = vmatpush.msrb.mxu3 %v1612_v39 }
 0x72a   :  { %986 = vmatpush.msrb.mxu3 %v1617_v40 }
 0x72c   :  { %987 = vmatpush.msrb.mxu3 %v1627_v43 }
 0x798   :  { %v529_v4 = vpop.f32.mrf.mxu1 }
 0x799   :  { %v532_v49 = vadd.f32 %v529_v4, %v509_v3 }
 0x79b   :  { %1292 = vtanh.f32 %v532_v49  ;;  %v1222_v52 = vmul.f32 -1.442695, %v532_v49 }
 0x7a0   :  { %v469_v5 = vpop.f32.mrf.mxu3 }
 0x7a1   :  { %v1293_v50 = vpop.eup %1292  ;;  %v470_v6 = vadd.f32 %v469_v5, %v1658_v46 }
 0x7a2   :  { %555 = vrot.lane.b32.xlu2 %v1293_v50, %s1489_s28 }
 0x7a3   :  { %1294 = vtanh.f32 %v470_v6  ;;  %v1220_v58 = vmul.f32 -1.442695, %v470_v6 }
 0x7a4   :  { %1296 = vpow2.f32 %v1222_v52 }
 0x7a9   :  { %v1295_v51 = vpop.eup %1294 }
 0x7aa   :  { %494 = vrot.lane.b32.xlu0 %v1295_v51, %s1489_s28  ;;  %v1297_v53 = vpop.eup %1296 }
 0x7ab   :  { %v536_v54 = vadd.f32 1.0, %v1297_v53 }
 0x7ad   :  { %1298 = vrcp.f32 %v536_v54  ;;  %v548_v61 = vand.u32 2147483648, %v536_v54  ;;  %vm542_vm10 = vweird.f32 %v536_v54  ;;  %v546_v62 = vand.u32 2147483647, %v536_v54 }
 0x7ae   :  { %1300 = vpow2.f32 %v1220_v58 }
 0x7af   :  { %v549_v1 = vor.u32 1.1754944e-38, %v548_v61  ;;  %vm547_vm12 = vcmp.eq.f32.partialorder %v546_v62, 8.507059e+37 }
 0x7b3   :  { %v1299_v55 = vpop.eup %1298 }
 0x7b4   :  { %v538_v56 = vmul.f32 %v1299_v55, %v536_v54  ;;  %vm543_vm9 = vweird.f32 %v1299_v55  ;;  %v1301_v63 = vpop.eup %1300 }
 0x7b5   :  { %vm544_vm11 = vmor %vm542_vm10, %vm543_vm9  ;;  %v475_v2 = vadd.f32 1.0, %v1301_v63 }
 0x7b6   :  { %v539_v57 = vsub.f32 1.0, %v538_v56 }
 0x7b7   :  { %1302 = vrcp.f32 %v475_v2  ;;  %v487_v15 = vand.u32 2147483648, %v475_v2  ;;  %vm481_vm14 = vweird.f32 %v475_v2  ;;  %v485_v16 = vand.u32 2147483647, %v475_v2 }
 0x7b8   :  { %v540_v59 = vmul.f32 %v1299_v55, %v539_v57 }
 0x7b9   :  { %v488_v18 = vor.u32 1.1754944e-38, %v487_v15  ;;  %vm486_vm0 = vcmp.eq.f32.partialorder %v485_v16, 8.507059e+37 }
 0x7ba   :  { %v541_v60 = vadd.f32 %v1299_v55, %v540_v59 }
 0x7bc   :  { %v545_v0 = vsel %vm544_vm11, %v1299_v55, %v541_v60 }
 0x7bd   :  { %v550_v8 = vsel %vm547_vm12, %v549_v1, %v545_v0  ;;  %v1303_v10 = vpop.eup %1302 }
 0x7be   :  { %v477_v11 = vmul.f32 %v1303_v10, %v475_v2  ;;  %vm482_vm13 = vweird.f32 %v1303_v10  ;;  %v553_v22 = vmul.f32 %v550_v8, %v1706_v41 }
 0x7bf   :  { %vm483_vm15 = vmor %vm481_vm14, %vm482_vm13 }
 0x7c0   :  { %v478_v12 = vsub.f32 1.0, %v477_v11 }
 0x7c2   :  { %v479_v13 = vmul.f32 %v1303_v10, %v478_v12 }
 0x7c4   :  { %v480_v14 = vadd.f32 %v1303_v10, %v479_v13 }
 0x7c6   :  { %v484_v17 = vsel %vm483_vm15, %v1303_v10, %v480_v14 }
 0x7c7   :  { %v489_v20 = vsel %vm486_vm0, %v488_v18, %v484_v17 }
 0x7c8   :  { %v492_v25 = vmul.f32 %v489_v20, %v1701_v28 }
 0x7fc   :  { %v556_v7 = vpop.permute.xlu2 %555 }
 0x7fd   :  { %v558_v9 = vmul.f32 %v556_v7, %v550_v8 }
 0x7ff   :  { %560 = vrot.lane.b32.xlu1 %v558_v9, %s1490_s3 }
 0x81c   :  { %v495_v19 = vpop.permute.xlu0 %494 }
 0x81d   :  { %v497_v21 = vmul.f32 %v495_v19, %v489_v20 }
 0x81f   :  { %499 = vrot.lane.b32.xlu2 %v497_v21, %s1490_s3 }
 0x871   :  { %v561_v23 = vpop.permute.xlu1 %560 }
 0x872   :  { %v1733_v24 = vadd.f32 %v561_v23, %v553_v22 }
 0x874   :  { %1304 = vtanh.f32 %v1733_v24 }
 0x879   :  { %v500_v27 = vpop.permute.xlu2 %499 }
 0x87a   :  { %v1305_v29 = vpop.eup %1304  ;;  %v1737_v31 = vadd.f32 %v500_v27, %v492_v25  ;;  %v769_v27 = vld [vmem:[#allocation2 + $0x5] sm:$0x1] }
 0x87b   :  { %566 = vrot.lane.b32.xlu0 %v1305_v29, %s1489_s28 }
 0x87c   :  { %1306 = vtanh.f32 %v1737_v31 }
 0x882   :  { %v1307_v33 = vpop.eup %1306 }
 0x883   :  { %505 = vrot.lane.b32.xlu1 %v1307_v33, %s1489_s28 }
 0x8ed   :  { %v567_v42 = vpop.permute.xlu0 %566 }
 0x8ee   :  { %v569_v41 = vmul.f32 %v567_v42, %v550_v8 }
 0x8f0   :  { %571 = vrot.lane.b32.xlu2 %v569_v41, %s1490_s3 }
 0x8f5   :  { %v506_v44 = vpop.permute.xlu1 %505 }
 0x8f6   :  { %v508_v26 = vmul.f32 %v506_v44, %v489_v20 }
 0x8f8   :  { %575 = vrot.lane.b32.xlu0 %v508_v26, %s1489_s28 }
 0x94a   :  { %v572_v28 = vpop.permute.xlu2 %571 }
 0x94b   :  { %1225 = vmatmul.msk.f32.vlgmr.msra.gmra.mxu0 %vm121_vm5, %v572_v28 }
 0x96a   :  { %v576_v32 = vpop.permute.xlu0 %575 }
 0x96b   :  { %v578_v45 = vsel %vm121_vm5, %v572_v28, %v576_v32 }
 0x96c   :  { %1223 = vmatmul.msk.f32.vlgmr.msrb.gmra.mxu2 %vm188_vm6, %v578_v45 }
 0x96d   :  { %1110 = vmatpush.msrb.mxu2 %v1591_v34 }
 0x96f   :  { %1111 = vmatpush.msrb.mxu2 %v1593_v35 }
 0x971   :  { %1112 = vmatpush.msrb.mxu2 %v1597_v36 }
 0x973   :  { %1113 = vmatpush.msrb.mxu2 %v1602_v37 }
 0x975   :  { %1114 = vmatpush.msrb.mxu2 %v1607_v38 }
 0x977   :  { %1115 = vmatpush.msrb.mxu2 %v1612_v39 }
 0x979   :  { %1116 = vmatpush.msrb.mxu2 %v1617_v40 }
 0x97b   :  { %1117 = vmatpush.msrb.mxu2 %v1627_v43 }
 0x9c8   :  { %v659_v30 = vpop.f32.mrf.mxu0 }
 0x9c9   :  { %v662_v48 = vadd.f32 %v659_v30, %v639_v47 }
 0x9cb   :  { %1308 = vtanh.f32 %v662_v48  ;;  %v1226_v37 = vmul.f32 -1.442695, %v662_v48 }
 0x9d1   :  { %v1309_v3 = vpop.eup %1308 }
 0x9d2   :  { %685 = vrot.lane.b32.xlu1 %v1309_v3, %s1489_s28 }
 0x9ef   :  { %v599_v34 = vpop.f32.mrf.mxu2 }
 0x9f0   :  { %v600_v35 = vadd.f32 %v599_v34, %v1658_v46 }
 0x9f2   :  { %1310 = vtanh.f32 %v600_v35  ;;  %v1224_v40 = vmul.f32 -1.442695, %v600_v35 }
 0x9f3   :  { %1312 = vpow2.f32 %v1226_v37 }
 0x9f8   :  { %v1311_v36 = vpop.eup %1310 }
 0x9f9   :  { %624 = vrot.lane.b32.xlu2 %v1311_v36, %s1489_s28  ;;  %v1313_v38 = vpop.eup %1312 }
 0x9fa   :  { %v666_v39 = vadd.f32 1.0, %v1313_v38 }
 0x9fc   :  { %1314 = vrcp.f32 %v666_v39  ;;  %v678_v53 = vand.u32 2147483648, %v666_v39  ;;  %vm672_vm2 = vweird.f32 %v666_v39  ;;  %v676_v54 = vand.u32 2147483647, %v666_v39 }
 0x9fd   :  { %1316 = vpow2.f32 %v1224_v40 }
 0x9fe   :  { %v679_v57 = vor.u32 1.1754944e-38, %v678_v53  ;;  %vm677_vm4 = vcmp.eq.f32.partialorder %v676_v54, 8.507059e+37 }
 0xa02   :  { %v1315_v43 = vpop.eup %1314 }
 0xa03   :  { %v1317_v4 = vpop.eup %1316  ;;  %v668_v49 = vmul.f32 %v1315_v43, %v666_v39  ;;  %vm673_vm1 = vweird.f32 %v1315_v43 }
 0xa04   :  { %v605_v5 = vadd.f32 1.0, %v1317_v4  ;;  %vm674_vm3 = vmor %vm672_vm2, %vm673_vm1 }
 0xa05   :  { %v669_v50 = vsub.f32 1.0, %v668_v49 }
 0xa06   :  { %1318 = vrcp.f32 %v605_v5  ;;  %v617_v0 = vand.u32 2147483648, %v605_v5  ;;  %vm611_vm8 = vweird.f32 %v605_v5  ;;  %v615_v1 = vand.u32 2147483647, %v605_v5 }
 0xa07   :  { %v670_v6 = vmul.f32 %v1315_v43, %v669_v50 }
 0xa08   :  { %v618_v7 = vor.u32 1.1754944e-38, %v617_v0  ;;  %vm616_vm10 = vcmp.eq.f32.partialorder %v615_v1, 8.507059e+37 }
 0xa09   :  { %v671_v52 = vadd.f32 %v1315_v43, %v670_v6 }
 0xa0b   :  { %v675_v56 = vsel %vm674_vm3, %v1315_v43, %v671_v52 }
 0xa0c   :  { %v1319_v51 = vpop.eup %1318  ;;  %v680_v58 = vsel %vm677_vm4, %v679_v57, %v675_v56 }
 0xa0d   :  { %v607_v55 = vmul.f32 %v1319_v51, %v605_v5  ;;  %vm612_vm7 = vweird.f32 %v1319_v51  ;;  %v683_v11 = vmul.f32 %v680_v58, %v1733_v24 }
 0xa0e   :  { %vm613_vm9 = vmor %vm611_vm8, %vm612_vm7 }
 0xa0f   :  { %v608_v60 = vsub.f32 1.0, %v607_v55 }
 0xa11   :  { %v609_v62 = vmul.f32 %v1319_v51, %v608_v60 }
 0xa13   :  { %v610_v63 = vadd.f32 %v1319_v51, %v609_v62 }
 0xa15   :  { %v614_v2 = vsel %vm613_vm9, %v1319_v51, %v610_v63 }
 0xa16   :  { %v619_v9 = vsel %vm616_vm10, %v618_v7, %v614_v2 }
 0xa17   :  { %v622_v15 = vmul.f32 %v619_v9, %v1737_v31 }
 0xa44   :  { %v686_v59 = vpop.permute.xlu1 %685 }
 0xa45   :  { %v688_v61 = vmul.f32 %v686_v59, %v680_v58 }
 0xa47   :  { %690 = vrot.lane.b32.xlu0 %v688_v61, %s1490_s3 }
 0xa53   :  { %v625_v8 = vpop.permute.xlu2 %624 }
 0xa54   :  { %v627_v10 = vmul.f32 %v625_v8, %v619_v9 }
 0xa56   :  { %629 = vrot.lane.b32.xlu1 %v627_v10, %s1490_s3 }
 0xab9   :  { %v691_v12 = vpop.permute.xlu0 %690 }
 0xaba   :  { %v1761_v13 = vadd.f32 %v691_v12, %v683_v11 }
 0xabc   :  { %1320 = vtanh.f32 %v1761_v13 }
 0xac2   :  { %v1321_v14 = vpop.eup %1320 }
 0xac3   :  { %696 = vrot.lane.b32.xlu2 %v1321_v14, %s1489_s28 }
 0xac8   :  { %v630_v16 = vpop.permute.xlu1 %629 }
 0xac9   :  { %v1766_v17 = vadd.f32 %v630_v16, %v622_v15  ;;  %v899_v15 = vld [vmem:[#allocation2 + $0x6] sm:$0x1] }
 0xacb   :  { %1322 = vtanh.f32 %v1766_v17 }
 0xad1   :  { %v1323_v18 = vpop.eup %1322 }
 0xad2   :  { %635 = vrot.lane.b32.xlu0 %v1323_v18, %s1489_s28 }
 0xb1d   :  { %v697_v19 = vpop.permute.xlu2 %696 }
 0xb1e   :  { %v699_v20 = vmul.f32 %v697_v19, %v680_v58 }
 0xb20   :  { %701 = vrot.lane.b32.xlu1 %v699_v20, %s1490_s3 }
 0xb44   :  { %v636_v21 = vpop.permute.xlu0 %635 }
 0xb45   :  { %v638_v22 = vmul.f32 %v636_v21, %v619_v9 }
 0xb47   :  { %705 = vrot.lane.b32.xlu2 %v638_v22, %s1489_s28 }
 0xb92   :  { %v702_v23 = vpop.permute.xlu1 %701 }
 0xb93   :  { %1229 = vmatmul.msk.f32.vlgmr.msra.gmra.mxu3 %vm121_vm5, %v702_v23 }
 0xba1   :  { %v706_v24 = vpop.permute.xlu2 %705 }
 0xba2   :  { %v708_v25 = vsel %vm121_vm5, %v702_v23, %v706_v24 }
 0xba3   :  { %1227 = vmatmul.msk.f32.vlgmr.msrb.gmra.mxu1 %vm188_vm6, %v708_v25 }
 0xc16   :  { %v789_v29 = vpop.f32.mrf.mxu3 }
 0xc17   :  { %v792_v31 = vadd.f32 %v789_v29, %v769_v27 }
 0xc19   :  { %1324 = vtanh.f32 %v792_v31  ;;  %v1230_v26 = vmul.f32 -1.442695, %v792_v31 }
 0xc1f   :  { %v1325_v33 = vpop.eup %1324 }
 0xc20   :  { %815 = vrot.lane.b32.xlu0 %v1325_v33, %s1489_s28  ;;  %v729_v42 = vpop.f32.mrf.mxu1 }
 0xc21   :  { %v730_v41 = vadd.f32 %v729_v42, %v1658_v46 }
 0xc23   :  { %1326 = vtanh.f32 %v730_v41  ;;  %v1228_v32 = vmul.f32 -1.442695, %v730_v41 }
 0xc24   :  { %1328 = vpow2.f32 %v1230_v26 }
 0xc25   :  { %1330 = vpow2.f32 %v1228_v32 }
 0xc29   :  { %v1327_v44 = vpop.eup %1326 }
 0xc2a   :  { %754 = vrot.lane.b32.xlu1 %v1327_v44, %s1489_s28  ;;  %v1329_v28 = vpop.eup %1328 }
 0xc2b   :  { %v796_v45 = vadd.f32 1.0, %v1329_v28  ;;  %v1331_v47 = vpop.eup %1330 }
 0xc2c   :  { %v735_v48 = vadd.f32 1.0, %v1331_v47 }
 0xc2d   :  { %1332 = vrcp.f32 %v796_v45  ;;  %v808_v39 = vand.u32 2147483648, %v796_v45  ;;  %vm802_vm12 = vweird.f32 %v796_v45  ;;  %v806_v40 = vand.u32 2147483647, %v796_v45 }
 0xc2e   :  { %1334 = vrcp.f32 %v735_v48  ;;  %v747_v53 = vand.u32 2147483648, %v735_v48  ;;  %vm741_vm0 = vweird.f32 %v735_v48  ;;  %v745_v54 = vand.u32 2147483647, %v735_v48 }
 0xc2f   :  { %v809_v49 = vor.u32 1.1754944e-38, %v808_v39  ;;  %vm807_vm14 = vcmp.eq.f32.partialorder %v806_v40, 8.507059e+37 }
 0xc30   :  { %v748_v56 = vor.u32 1.1754944e-38, %v747_v53  ;;  %vm746_vm2 = vcmp.eq.f32.partialorder %v745_v54, 8.507059e+37 }
 0xc33   :  { %v1333_v30 = vpop.eup %1332 }
 0xc34   :  { %v798_v3 = vmul.f32 %v1333_v30, %v796_v45  ;;  %v1335_v35 = vpop.eup %1334  ;;  %vm803_vm11 = vweird.f32 %v1333_v30 }
 0xc35   :  { %v737_v37 = vmul.f32 %v1335_v35, %v735_v48  ;;  %vm804_vm13 = vmor %vm802_vm12, %vm803_vm11  ;;  %vm742_vm15 = vweird.f32 %v1335_v35 }
 0xc36   :  { %v799_v34 = vsub.f32 1.0, %v798_v3  ;;  %vm743_vm1 = vmor %vm741_vm0, %vm742_vm15 }
 0xc37   :  { %v738_v43 = vsub.f32 1.0, %v737_v37 }
 0xc38   :  { %v800_v36 = vmul.f32 %v1333_v30, %v799_v34 }
 0xc39   :  { %v739_v5 = vmul.f32 %v1335_v35, %v738_v43 }
 0xc3a   :  { %v801_v38 = vadd.f32 %v1333_v30, %v800_v36 }
 0xc3b   :  { %v740_v52 = vadd.f32 %v1335_v35, %v739_v5 }
 0xc3c   :  { %v805_v4 = vsel %vm804_vm13, %v1333_v30, %v801_v38 }
 0xc3d   :  { %v810_v6 = vsel %vm807_vm14, %v809_v49, %v805_v4  ;;  %v744_v55 = vsel %vm743_vm1, %v1335_v35, %v740_v52 }
 0xc3e   :  { %v749_v58 = vsel %vm746_vm2, %v748_v56, %v744_v55  ;;  %v813_v60 = vmul.f32 %v810_v6, %v1761_v13 }
 0xc3f   :  { %v752_v0 = vmul.f32 %v749_v58, %v1766_v17 }
 0xc92   :  { %v816_v50 = vpop.permute.xlu0 %815 }
 0xc93   :  { %v818_v51 = vmul.f32 %v816_v50, %v810_v6 }
 0xc95   :  { %820 = vrot.lane.b32.xlu2 %v818_v51, %s1490_s3 }
 0xc9c   :  { %v755_v57 = vpop.permute.xlu1 %754 }
 0xc9d   :  { %v757_v59 = vmul.f32 %v755_v57, %v749_v58 }
 0xc9f   :  { %759 = vrot.lane.b32.xlu0 %v757_v59, %s1490_s3 }
 0xcef   :  { %v821_v61 = vpop.permute.xlu2 %820 }
 0xcf0   :  { %v1781_v62 = vadd.f32 %v821_v61, %v813_v60 }
 0xcf2   :  { %1336 = vtanh.f32 %v1781_v62 }
 0xcf8   :  { %v1337_v63 = vpop.eup %1336 }
 0xcf9   :  { %826 = vrot.lane.b32.xlu1 %v1337_v63, %s1489_s28  ;;  %v1029_v63 = vld [vmem:[#allocation2 + $0x7] sm:$0x1] }
 0xd11   :  { %v760_v1 = vpop.permute.xlu0 %759 }
 0xd12   :  { %v1786_v2 = vadd.f32 %v760_v1, %v752_v0 }
 0xd14   :  { %1338 = vtanh.f32 %v1786_v2 }
 0xd1a   :  { %v1339_v7 = vpop.eup %1338 }
 0xd1b   :  { %765 = vrot.lane.b32.xlu2 %v1339_v7, %s1489_s28 }
 0xd6b   :  { %v827_v8 = vpop.permute.xlu1 %826 }
 0xd6c   :  { %v829_v9 = vmul.f32 %v827_v8, %v810_v6  ;;  %v1819_v8 = vld [vmem:[%s1862_s5] sm:$0x1] }
 0xd6e   :  { %831 = vrot.lane.b32.xlu0 %v829_v9, %s1490_s3 }
 0xd75   :  { %v766_v10 = vpop.permute.xlu2 %765 }
 0xd76   :  { %v768_v11 = vmul.f32 %v766_v10, %v749_v58 }
 0xd78   :  { %835 = vrot.lane.b32.xlu1 %v768_v11, %s1489_s28 }
 0xde0   :  { %v832_v12 = vpop.permute.xlu0 %831 }
 0xde1   :  { %1233 = vmatmul.msk.f32.vlgmr.msra.gmra.mxu2 %vm121_vm5, %v832_v12 }
 0xdea   :  { %v836_v13 = vpop.permute.xlu1 %835 }
 0xdeb   :  { %v838_v14 = vsel %vm121_vm5, %v832_v12, %v836_v13 }
 0xdec   :  { %1231 = vmatmul.msk.f32.vlgmr.msrb.gmra.mxu0 %vm188_vm6, %v838_v14 }
 0xe64   :  { %v919_v16 = vpop.f32.mrf.mxu2 }
 0xe65   :  { %v922_v17 = vadd.f32 %v919_v16, %v899_v15 }
 0xe67   :  { %1340 = vtanh.f32 %v922_v17  ;;  %v1234_v25 = vmul.f32 -1.442695, %v922_v17 }
 0xe69   :  { %v859_v18 = vpop.f32.mrf.mxu0 }
 0xe6a   :  { %v860_v19 = vadd.f32 %v859_v18, %v1658_v46 }
 0xe6c   :  { %1342 = vtanh.f32 %v860_v19  ;;  %v1232_v22 = vmul.f32 -1.442695, %v860_v19 }
 0xe6d   :  { %v1341_v20 = vpop.eup %1340 }
 0xe6e   :  { %945 = vrot.lane.b32.xlu0 %v1341_v20, %s1489_s28  ;;  %1344 = vpow2.f32 %v1232_v22 }
 0xe72   :  { %v1343_v21 = vpop.eup %1342 }
 0xe73   :  { %884 = vrot.lane.b32.xlu2 %v1343_v21, %s1489_s28 }
 0xe74   :  { %v1345_v23 = vpop.eup %1344 }
 0xe75   :  { %v865_v24 = vadd.f32 1.0, %v1345_v23 }
 0xe77   :  { %1346 = vrcp.f32 %v865_v24  ;;  %v877_v44 = vand.u32 2147483648, %v865_v24  ;;  %vm871_vm4 = vweird.f32 %v865_v24  ;;  %v875_v26 = vand.u32 2147483647, %v865_v24 }
 0xe78   :  { %1348 = vpow2.f32 %v1234_v25 }
 0xe79   :  { %v878_v45 = vor.u32 1.1754944e-38, %v877_v44  ;;  %vm876_vm8 = vcmp.eq.f32.partialorder %v875_v26, 8.507059e+37 }
 0xe7d   :  { %v1347_v27 = vpop.eup %1346 }
 0xe7e   :  { %v867_v29 = vmul.f32 %v1347_v27, %v865_v24  ;;  %v1349_v31 = vpop.eup %1348  ;;  %vm872_vm3 = vweird.f32 %v1347_v27 }
 0xe7f   :  { %v926_v42 = vadd.f32 1.0, %v1349_v31  ;;  %vm873_vm7 = vmor %vm871_vm4, %vm872_vm3 }
 0xe80   :  { %v868_v33 = vsub.f32 1.0, %v867_v29 }
 0xe81   :  { %1350 = vrcp.f32 %v926_v42  ;;  %v938_v37 = vand.u32 2147483648, %v926_v42  ;;  %vm932_vm10 = vweird.f32 %v926_v42  ;;  %v936_v38 = vand.u32 2147483647, %v926_v42 }
 0xe82   :  { %v869_v46 = vmul.f32 %v1347_v27, %v868_v33 }
 0xe83   :  { %v939_v40 = vor.u32 1.1754944e-38, %v938_v37  ;;  %vm937_vm12 = vcmp.eq.f32.partialorder %v936_v38, 8.507059e+37 }
 0xe84   :  { %v870_v41 = vadd.f32 %v1347_v27, %v869_v46 }
 0xe86   :  { %v874_v32 = vsel %vm873_vm7, %v1347_v27, %v870_v41 }
 0xe87   :  { %v1351_v28 = vpop.eup %1350  ;;  %v879_v30 = vsel %vm876_vm8, %v878_v45, %v874_v32 }
 0xe88   :  { %v928_v48 = vmul.f32 %v1351_v28, %v926_v42  ;;  %vm933_vm9 = vweird.f32 %v1351_v28  ;;  %v882_v51 = vmul.f32 %v879_v30, %v1786_v2 }
 0xe89   :  { %vm934_vm11 = vmor %vm932_vm10, %vm933_vm9  ;;  %vm1189_vm10 = vcmask 24576  }
 0xe8a   :  { %v929_v34 = vsub.f32 1.0, %v928_v48 }
 0xe8c   :  { %v930_v35 = vmul.f32 %v1351_v28, %v929_v34 }
 0xe8e   :  { %v931_v36 = vadd.f32 %v1351_v28, %v930_v35 }
 0xe90   :  { %v935_v39 = vsel %vm934_vm11, %v1351_v28, %v931_v36 }
 0xe91   :  { %v940_v4 = vsel %vm937_vm12, %v939_v40, %v935_v39 }
 0xe92   :  { %v943_v5 = vmul.f32 %v940_v4, %v1781_v62 }
 0xecd   :  { %v885_v47 = vpop.permute.xlu2 %884 }
 0xece   :  { %v887_v3 = vmul.f32 %v885_v47, %v879_v30 }
 0xed0   :  { %889 = vrot.lane.b32.xlu1 %v887_v3, %s1490_s3 }
 0xee0   :  { %v946_v43 = vpop.permute.xlu0 %945 }
 0xee1   :  { %v948_v49 = vmul.f32 %v946_v43, %v940_v4 }
 0xee3   :  { %950 = vrot.lane.b32.xlu2 %v948_v49, %s1490_s3 }
 0xf3d   :  { %v951_v50 = vpop.permute.xlu2 %950 }
 0xf3e   :  { %v1801_v6 = vadd.f32 %v951_v50, %v943_v5 }
 0xf40   :  { %1352 = vtanh.f32 %v1801_v6 }
 0xf42   :  { %v890_v52 = vpop.permute.xlu1 %889 }
 0xf43   :  { %v1805_v53 = vadd.f32 %v890_v52, %v882_v51 }
 0xf45   :  { %1354 = vtanh.f32 %v1805_v53 }
 0xf46   :  { %v1353_v54 = vpop.eup %1352 }
 0xf47   :  { %956 = vrot.lane.b32.xlu1 %v1353_v54, %s1489_s28 }
 0xf4b   :  { %v1355_v55 = vpop.eup %1354 }
 0xf4c   :  { %895 = vrot.lane.b32.xlu0 %v1355_v55, %s1489_s28 }
 0xfb9   :  { %v957_v56 = vpop.permute.xlu1 %956 }
 0xfba   :  { %v959_v57 = vmul.f32 %v957_v56, %v940_v4 }
 0xfbc   :  { %961 = vrot.lane.b32.xlu2 %v959_v57, %s1490_s3 }
 0xfbe   :  { %v896_v58 = vpop.permute.xlu0 %895 }
 0xfbf   :  { %v898_v59 = vmul.f32 %v896_v58, %v879_v30 }
 0xfc1   :  { %965 = vrot.lane.b32.xlu0 %v898_v59, %s1489_s28 }
0x1016   :  { %v962_v60 = vpop.permute.xlu2 %961 }
0x1017   :  { %1237 = vmatmul.msk.f32.vlgmr.msra.gmra.mxu1 %vm121_vm5, %v962_v60 }
0x1033   :  { %v966_v61 = vpop.permute.xlu0 %965 }
0x1034   :  { %v968_v62 = vsel %vm121_vm5, %v962_v60, %v966_v61 }
0x1035   :  { %1235 = vmatmul.msk.f32.vlgmr.msrb.gmra.mxu3 %vm188_vm6, %v968_v62 }
0x1094   :  { %v1049_v0 = vpop.f32.mrf.mxu1 }
0x1095   :  { %v1052_v1 = vadd.f32 %v1049_v0, %v1029_v63 }
0x1097   :  { %1356 = vtanh.f32 %v1052_v1  ;;  %v1238_v11 = vmul.f32 -1.442695, %v1052_v1 }
0x109d   :  { %v1357_v2 = vpop.eup %1356 }
0x109e   :  { %1075 = vrot.lane.b32.xlu2 %v1357_v2, %s1489_s28 }
0x10b8   :  { %v989_v7 = vpop.f32.mrf.mxu3 }
0x10b9   :  { %v990_v9 = vadd.f32 %v1819_v8, %v989_v7 }
0x10bb   :  { %1358 = vtanh.f32 %v990_v9  ;;  %v1236_v27 = vmul.f32 -1.442695, %v990_v9 }
0x10bc   :  { %1360 = vpow2.f32 %v1238_v11 }
0x10c1   :  { %v1359_v10 = vpop.eup %1358 }
0x10c2   :  { %1014 = vrot.lane.b32.xlu1 %v1359_v10, %s1489_s28  ;;  %v1361_v12 = vpop.eup %1360 }
0x10c3   :  { %v1056_v13 = vadd.f32 1.0, %v1361_v12 }
0x10c5   :  { %1362 = vrcp.f32 %v1056_v13  ;;  %v1068_v19 = vand.u32 2147483648, %v1056_v13  ;;  %vm1062_vm14 = vweird.f32 %v1056_v13  ;;  %v1066_v20 = vand.u32 2147483647, %v1056_v13 }
0x10c6   :  { %1364 = vpow2.f32 %v1236_v27 }
0x10c7   :  { %v1069_v22 = vor.u32 1.1754944e-38, %v1068_v19  ;;  %vm1067_vm0 = vcmp.eq.f32.partialorder %v1066_v20, 8.507059e+37 }
0x10cb   :  { %v1363_v14 = vpop.eup %1362 }
0x10cc   :  { %v1058_v15 = vmul.f32 %v1363_v14, %v1056_v13  ;;  %vm1063_vm13 = vweird.f32 %v1363_v14  ;;  %v1365_v29 = vpop.eup %1364 }
0x10cd   :  { %vm1064_vm15 = vmor %vm1062_vm14, %vm1063_vm13  ;;  %v995_v31 = vadd.f32 1.0, %v1365_v29 }
0x10ce   :  { %v1059_v16 = vsub.f32 1.0, %v1058_v15  ;;  %v1161_v15 = vld [vmem:[%s1863_s6 + $0x10] sm:$0xff] }
0x10cf   :  { %1366 = vrcp.f32 %v995_v31  ;;  %v1007_v26 = vand.u32 2147483648, %v995_v31  ;;  %vm1001_vm2 = vweird.f32 %v995_v31  ;;  %v1005_v28 = vand.u32 2147483647, %v995_v31 }
0x10d0   :  { %v1060_v17 = vmul.f32 %v1363_v14, %v1059_v16  ;;  %v1160_v16 = vld [vmem:[%s1863_s6 + $0x8] sm:$0xff] }
0x10d1   :  { %v1008_v45 = vor.u32 1.1754944e-38, %v1007_v26  ;;  %vm1006_vm4 = vcmp.eq.f32.partialorder %v1005_v28, 8.507059e+37 }
0x10d2   :  { %v1061_v18 = vadd.f32 %v1363_v14, %v1060_v17  ;;  %v1159_v17 = vld [vmem:[%s1863_s6] sm:$0xff] }
0x10d4   :  { %v1065_v21 = vsel %vm1064_vm15, %v1363_v14, %v1061_v18  ;;  %v1162_v14 = vld [vmem:[%s1863_s6 + $0x18] sm:$0xff] }
0x10d5   :  { %v1070_v24 = vsel %vm1067_vm0, %v1069_v22, %v1065_v21  ;;  %v1367_v33 = vpop.eup %1366  ;;  %1181 = vmatpush.msra.mxu0 %v1162_v14  ;;  %v1163_v21 = vld [vmem:[%s1864_s7] sm:$0x1] }
0x10d6   :  { %v997_v42 = vmul.f32 %v1367_v33, %v995_v31  ;;  %vm1002_vm1 = vweird.f32 %v1367_v33  ;;  %v1073_v3 = vmul.f32 %v1070_v24, %v1801_v6 }
0x10d7   :  { %vm1003_vm3 = vmor %vm1001_vm2, %vm1002_vm1  ;;  %1182 = vmatpush.msra.mxu0 %v1161_v15 }
0x10d8   :  { %v998_v46 = vsub.f32 1.0, %v997_v42 }
0x10d9   :  { %1183 = vmatpush.msra.mxu0 %v1160_v16 }
0x10da   :  { %v999_v41 = vmul.f32 %v1367_v33, %v998_v46 }
0x10db   :  { %1184 = vmatpush.msra.mxu0 %v1159_v17 }
0x10dc   :  { %v1000_v44 = vadd.f32 %v1367_v33, %v999_v41 }
0x10de   :  { %v1004_v32 = vsel %vm1003_vm3, %v1367_v33, %v1000_v44 }
0x10df   :  { %v1009_v30 = vsel %vm1006_vm4, %v1008_v45, %v1004_v32 }
0x10e0   :  { %v1012_v37 = vmul.f32 %v1009_v30, %v1805_v53 }
0x10f8   :  { %v1076_v23 = vpop.permute.xlu2 %1075 }
0x10f9   :  { %v1078_v25 = vmul.f32 %v1076_v23, %v1070_v24 }
0x10fb   :  { %1080 = vrot.lane.b32.xlu1 %v1078_v25, %s1490_s3 }
0x1134   :  { %v1015_v47 = vpop.permute.xlu1 %1014 }
0x1135   :  { %v1017_v48 = vmul.f32 %v1015_v47, %v1009_v30 }
0x1137   :  { %1019 = vrot.lane.b32.xlu0 %v1017_v48, %s1490_s3 }
0x116d   :  { %v1081_v34 = vpop.permute.xlu1 %1080 }
0x116e   :  { %v1083_v35 = vadd.f32 %v1081_v34, %v1073_v3 }
0x1170   :  { %1368 = vtanh.f32 %v1083_v35 }
0x1176   :  { %v1369_v36 = vpop.eup %1368 }
0x1177   :  { %1086 = vrot.lane.b32.xlu0 %v1369_v36, %s1489_s28 }
0x11a9   :  { %v1020_v38 = vpop.permute.xlu0 %1019 }
0x11aa   :  { %v1022_v39 = vadd.f32 %v1020_v38, %v1012_v37 }
0x11ac   :  { %1370 = vtanh.f32 %v1022_v39 }
0x11b2   :  { %v1371_v40 = vpop.eup %1370 }
0x11b3   :  { %1025 = vrot.lane.b32.xlu2 %v1371_v40, %s1489_s28 }
0x11e9   :  { %v1087_v43 = vpop.permute.xlu0 %1086 }
0x11ea   :  { %v1089_v4 = vmul.f32 %v1087_v43, %v1070_v24 }
0x11ec   :  { %1091 = vrot.lane.b32.xlu1 %v1089_v4, %s1490_s3 }
0x120d   :  { %v1026_v49 = vpop.permute.xlu2 %1025 }
0x120e   :  { %v1028_v5 = vmul.f32 %v1026_v49, %v1009_v30 }
0x1210   :  { %1095 = vrot.lane.b32.xlu2 %v1028_v5, %s1489_s28 }
0x125e   :  { %v1092_v50 = vpop.permute.xlu1 %1091 }
0x126a   :  { %v1096_v6 = vpop.permute.xlu2 %1095 }
0x126b   :  { %v1098_v51 = vsel %vm121_vm5, %v1092_v50, %v1096_v6 }
0x126c   :  { %1239 = vmatmul.msk.f32.vlgmr.msrb.gmra.mxu2 %vm188_vm6, %v1098_v51 }
0x12ef   :  { %v1119_v52 = vpop.f32.mrf.mxu2 }
0x12f0   :  { %v1120_v53 = vadd.f32 %v1819_v8, %v1119_v52 }
0x12f2   :  { %1372 = vtanh.f32 %v1120_v53  ;;  %v1240_v55 = vmul.f32 -1.442695, %v1120_v53 }
0x12f4   :  { %1374 = vpow2.f32 %v1240_v55 }
0x12f8   :  { %v1373_v54 = vpop.eup %1372 }
0x12f9   :  { %1144 = vrot.lane.b32.xlu0 %v1373_v54, %s1489_s28 }
0x12fa   :  { %v1375_v56 = vpop.eup %1374 }
0x12fb   :  { %v1125_v57 = vadd.f32 1.0, %v1375_v56 }
0x12fd   :  { %1376 = vrcp.f32 %v1125_v57  ;;  %v1137_v63 = vand.u32 2147483648, %v1125_v57  ;;  %vm1131_vm6 = vweird.f32 %v1125_v57  ;;  %v1135_v0 = vand.u32 2147483647, %v1125_v57 }
0x12ff   :  { %v1138_v2 = vor.u32 1.1754944e-38, %v1137_v63  ;;  %vm1136_vm9 = vcmp.eq.f32.partialorder %v1135_v0, 8.507059e+37 }
0x1303   :  { %v1377_v58 = vpop.eup %1376 }
0x1304   :  { %v1127_v59 = vmul.f32 %v1377_v58, %v1125_v57  ;;  %vm1132_vm7 = vweird.f32 %v1377_v58 }
0x1305   :  { %vm1133_vm8 = vmor %vm1131_vm6, %vm1132_vm7 }
0x1306   :  { %v1128_v60 = vsub.f32 1.0, %v1127_v59 }
0x1308   :  { %v1129_v61 = vmul.f32 %v1377_v58, %v1128_v60 }
0x130a   :  { %v1130_v62 = vadd.f32 %v1377_v58, %v1129_v61 }
0x130c   :  { %v1134_v1 = vsel %vm1133_vm8, %v1377_v58, %v1130_v62 }
0x130d   :  { %v1139_v8 = vsel %vm1136_vm9, %v1138_v2, %v1134_v1 }
0x130e   :  { %v1142_v10 = vmul.f32 %v1139_v8, %v1022_v39 }
0x136b   :  { %v1145_v7 = vpop.permute.xlu0 %1144 }
0x136c   :  { %v1147_v9 = vmul.f32 %v1145_v7, %v1139_v8 }
0x136e   :  { %1149 = vrot.lane.b32.xlu1 %v1147_v9, %s1490_s3 }
0x13e0   :  { %v1150_v11 = vpop.permute.xlu1 %1149 }
0x13e1   :  { %v1152_v12 = vadd.f32 %v1150_v11, %v1142_v10 }
0x13e3   :  { %1378 = vtanh.f32 %v1152_v12 }
0x13e9   :  { %v1379_v13 = vpop.eup %1378 }
0x13ea   :  { %1155 = vrot.lane.b32.xlu2 %v1379_v13, %s1489_s28 }
0x1444   :  { %v1156_v18 = vpop.permute.xlu2 %1155 }
0x1445   :  { %v1158_v19 = vmul.f32 %v1156_v18, %v1139_v8 }
0x1447   :  { %1165 = vrot.lane.b32.xlu0 %v1158_v19, %s1490_s3 }
0x14b9   :  { %v1166_v20 = vpop.permute.xlu0 %1165 }
0x14ba   :  { %1241 = vmatmul.msk.f32.vlgmr.msra.gmra.mxu0 %vm121_vm5, %v1166_v20 }
0x1537   :  { %v1186_v22 = vpop.f32.mrf.mxu0 }
0x1538   :  { %v1187_v23 = vadd.f32 %v1186_v22, %v1163_v21 }
0x153a   :  { %1190 = vst.msk [vmem:[#allocation9] sm:$0x1] %vm1189_vm10, %v1187_v23 }
0x153b   :  { %1201 = dma.vmem_to_hbm [thread:$0]  %s1197_s20, 16, %s1199_s4, [#allocation5]  }
0x153c   :  { %1481 = dma.done.wait [#allocation5], 16  }
0x153d   :  { %1482 = vsyncadd [#allocation5], 4294967280 }
0x153e   :  { %1206 = vsyncpa [#allocation4], 1 }
0x153f   :  { %1207 = vsyncpa [#allocation7], 1 }
0x1540   :  { %1208 = vsyncpa [#allocation5], 1 }

</bundles_post_ra>
